<compile_context>
chip_gen: v5e
topology: v5e:2x2
jax: 0.10.0
libtpu: 0.0.40
codegen_flags: <defaults>
</compile_context>

<pallas_src>
import jax
import jax.numpy as jnp
from jax import lax
from jax.experimental import pallas as pl
from jax.experimental.pallas import tpu as pltpu


def _tensorcores_per_chip():
    """2 TensorCores per chip on v7x (megacore sharding pays off); 1 on v5e/v6e."""
    try:
        kind = jax.devices()[0].device_kind.lower()
    except Exception:
        return 1
    if "v7" in kind or "7x" in kind:
        return 2
    return 1


def _attn_kernel(q_ref, k_ref, v_ref,
                 wq_t_ref, bq_ref, wk_t_ref, bk_ref,
                 inv_scale_ref, o_ref):
    # Per-group tiles:
    #   q_ref (GH, Sq, D), k_ref (GH, D, D), v_ref (GH, X, D)
    #   o_ref (Sq, GH*X)  -- lane-dense packed output slab
    GH, Sq, D = q_ref.shape
    X = v_ref.shape[1]

    # --- Linear projections as a single 2-D matmul per weight --------------
    # Leading-dim collapse only (minor dims untouched, second-minor is a
    # multiple of 8) -> free reshape, one MXU weight push per projection.
    q2 = q_ref[...].reshape(GH * Sq, D)
    k2 = k_ref[...].reshape(GH * D, D)
    q = (jnp.dot(q2, wq_t_ref[...], preferred_element_type=jnp.float32)
         + bq_ref[...]).reshape(GH, Sq, D)
    k = (jnp.dot(k2, wk_t_ref[...], preferred_element_type=jnp.float32)
         + bk_ref[...]).reshape(GH, D, D)

    # scaled_qk = (q @ k) / inv_scale_factor  (reciprocal-multiply; scale is a
    # scalar in SMEM).  NOTE: scale applied BEFORE the row max, so negative
    # inv_scale values remain correct.
    inv = 1.0 / inv_scale_ref[0]
    qk = lax.dot_general(q, k, (((2,), (1,)), ((0,), (0,))),
                         preferred_element_type=jnp.float32)          # (GH,Sq,D)
    scaled = qk * inv

    # Numerically-stable softmax; exact normalization deferred until after the
    # small p @ V^T matmul (X < D -> fewer elements to scale).
    m = jnp.max(scaled, axis=-1, keepdims=True)
    e = jnp.exp(scaled - m)
    denom = jnp.sum(e, axis=-1, keepdims=True)                        # (GH,Sq,1)

    # TODO(synk): training-mode F.dropout(p=dropout_p) (Bernoulli mask +
    # 1/(1-p) rescale; p == 1 zeroes the tensor) is not reproduced —
    # implemented as eval-mode identity.

    # out = softmax(qk) @ value^T  == contract the shared last dim per head.
    o = lax.dot_general(e, v_ref[...], (((2,), (2,)), ((0,), (0,))),
                        preferred_element_type=jnp.float32)           # (GH,Sq,X)
    o = o / denom                                                      # exact

    # Lane-dense store: pack the GH per-head (Sq, X) tiles along the lane axis
    # so the written block is (Sq, GH*X) (>= 128 lanes -> unmasked stores and a
    # dense writeback DMA) instead of GH masked 16-lane partial stores.
    o2d = jnp.concatenate([o[g] for g in range(GH)], axis=-1)          # (Sq,GH*X)
    o_ref[...] = o2d.astype(o_ref.dtype)


def prepare_params(wq, bq, wk, bk, inv_scale):
    """One-time parameter prep (hoisted out of the per-call wrapper)."""
    wq_t = jnp.asarray(wq, jnp.float32).T            # (D, D)
    wk_t = jnp.asarray(wk, jnp.float32).T            # (D, D)
    bq2 = jnp.asarray(bq, jnp.float32).reshape(1, -1)
    bk2 = jnp.asarray(bk, jnp.float32).reshape(1, -1)
    inv_s = jnp.asarray(inv_scale, jnp.float32).reshape(1)
    return wq_t, bq2, wk_t, bk2, inv_s


def model_forward(query, key, value, wq_t, bq2, wk_t, bk2, inv_s, *,
                  num_groups=None):
    B, H, Sq, D = query.shape
    assert key.shape == (B, H, D, D)
    X = value.shape[2]
    assert value.shape == (B, H, X, D)
    BH = B * H

    # Grid = number of head-groups.  2 only on dual-TensorCore chips (v7x) so
    # each core owns one group; fully collapsed (1 step) on v5e/v6e.
    if num_groups is None:
        cores = _tensorcores_per_chip()
        num_groups = cores if (cores > 1 and BH % cores == 0) else 1
    G = num_groups
    assert BH % G == 0
    GH = BH // G

    q3 = query.reshape(BH, Sq, D)
    k3 = key.reshape(BH, D, D)
    v3 = value.reshape(BH, X, D)

    # Advisory cost hint: this custom call is trivially cheap.
    flops = 2 * BH * (Sq * D * D + D * D * D + Sq * D * D + Sq * D * X)
    bytes_accessed = 4 * (BH * Sq * D + BH * D * D + BH * X * D
                          + BH * Sq * X + 2 * D * D + 2 * D + 1)
    cost = pl.CostEstimate(flops=flops,
                           transcendentals=BH * Sq * D,
                           bytes_accessed=bytes_accessed)

    out2d = pl.pallas_call(
        _attn_kernel,
        out_shape=jax.ShapeDtypeStruct((G, Sq, GH * X), query.dtype),
        grid=(G,),
        in_specs=[
            pl.BlockSpec((GH, Sq, D), lambda i: (i, 0, 0)),     # query group
            pl.BlockSpec((GH, D, D), lambda i: (i, 0, 0)),      # key group
            pl.BlockSpec((GH, X, D), lambda i: (i, 0, 0)),      # value group
            pl.BlockSpec((D, D), lambda i: (0, 0)),             # Wq^T (resident)
            pl.BlockSpec((1, D), lambda i: (0, 0)),             # bq
            pl.BlockSpec((D, D), lambda i: (0, 0)),             # Wk^T (resident)
            pl.BlockSpec((1, D), lambda i: (0, 0)),             # bk
            pl.BlockSpec(memory_space=pltpu.MemorySpace.SMEM),  # inv_scale
        ],
        out_specs=pl.BlockSpec((None, Sq, GH * X), lambda i: (i, 0, 0)),
        compiler_params=pltpu.CompilerParams(
            dimension_semantics=("parallel",) if G > 1 else ("arbitrary",)),
        cost_estimate=cost,
    )(q3, k3, v3, wq_t, bq2, wk_t, bk2, inv_s)

    # (G, Sq, GH*X) -> (B, H, Sq, X): cheap wrapper-side layout plumbing.
    out = out2d.reshape(G, Sq, GH, X).transpose(0, 2, 1, 3)
    return out.reshape(B, H, Sq, X)


def ref_forward(query, key, value, wq, bq, wk, bk, inv_scale):
    q = jnp.einsum('bhsd,ed->bhse', query, wq) + bq
    k = jnp.einsum('bhsd,ed->bhse', key, wk) + bk
    qk = jnp.einsum('bhsd,bhde->bhse', q, k)
    scaled = qk / inv_scale
    p = jax.nn.softmax(scaled, axis=-1)
    v = jnp.swapaxes(value, -2, -1)
    return jnp.einsum('bhsd,bhdx->bhsx', p, v)


if __name__ == "__main__":
    # Small, self-consistent shapes (H=8 matches the original module's heads).
    B, H, Sq, D, X = 2, 8, 16, 32, 16

    root = jax.random.PRNGKey(0)
    kq, kk, kv, kwq, kbq, kwk, kbk = jax.random.split(root, 7)

    query = jax.random.normal(kq, (B, H, Sq, D), jnp.float32)
    key = jax.random.normal(kk, (B, H, D, D), jnp.float32)
    value = jax.random.normal(kv, (B, H, X, D), jnp.float32)

    # Deterministic Linear(D, D) parameters (PyTorch-style uniform init bounds).
    bound = 1.0 / (D ** 0.5)
    wq = jax.random.uniform(kwq, (D, D), jnp.float32, -bound, bound)
    bq = jax.random.uniform(kbq, (D,), jnp.float32, -bound, bound)
    wk = jax.random.uniform(kwk, (D, D), jnp.float32, -bound, bound)
    bk = jax.random.uniform(kbk, (D,), jnp.float32, -bound, bound)
    inv_scale = jnp.float32(1.0)    # nn.Parameter(torch.tensor(1.0))

    # Parameter prep hoisted out of the forward wrapper (done once).
    wq_t, bq2, wk_t, bk2, inv_s = prepare_params(wq, bq, wk, bk, inv_scale)

    out = model_forward(query, key, value, wq_t, bq2, wk_t, bk2, inv_s)
    out = jax.block_until_ready(out)

    expected = ref_forward(query, key, value, wq, bq, wk, bk, inv_scale)
    assert out.shape == (B, H, Sq, X)
    assert jnp.allclose(out, expected, rtol=1e-3, atol=1e-3), "mismatch vs reference"

    print("KERNEL_OK")
</pallas_src>

<mosaic_0001>
module attributes {stable_mosaic.version = 11 : i64} {
  func.func @_attn_kernel(%arg0: i32, %arg1: memref<16x16x32xf32, #tpu.memory_space<vmem>>, %arg2: memref<16x32x32xf32, #tpu.memory_space<vmem>>, %arg3: memref<16x16x32xf32, #tpu.memory_space<vmem>>, %arg4: memref<32x32xf32, #tpu.memory_space<vmem>>, %arg5: memref<1x32xf32, #tpu.memory_space<vmem>>, %arg6: memref<32x32xf32, #tpu.memory_space<vmem>>, %arg7: memref<1x32xf32, #tpu.memory_space<vmem>>, %arg8: memref<1xf32, #tpu.memory_space<smem>>, %arg9: memref<1x16x256xf32, #tpu.memory_space<vmem>>) attributes {dimension_semantics = [#tpu.dimension_semantics<arbitrary>], iteration_bounds = array<i64: 1>, scalar_prefetch = 0 : i64, scratch_operands = 0 : i64, tpu.core_type = #tpu.core_type<tc>, window_params = [{transform_indices = @transform_0, window_bounds = array<i64: 16, 16, 32>}, {transform_indices = @transform_1, window_bounds = array<i64: 16, 32, 32>}, {transform_indices = @transform_2, window_bounds = array<i64: 16, 16, 32>}, {pipeline_mode = #tpu.pipeline_mode<synchronous>, transform_indices = @transform_3, window_bounds = array<i64: 32, 32>}, {pipeline_mode = #tpu.pipeline_mode<synchronous>, transform_indices = @transform_4, window_bounds = array<i64: 1, 32>}, {pipeline_mode = #tpu.pipeline_mode<synchronous>, transform_indices = @transform_5, window_bounds = array<i64: 32, 32>}, {pipeline_mode = #tpu.pipeline_mode<synchronous>, transform_indices = @transform_6, window_bounds = array<i64: 1, 32>}, {transform_indices = @transform_7, window_bounds = array<i64: 1>}, {transform_indices = @transform_8, window_bounds = array<i64: 1, 16, 256>}]} {
    %c0 = arith.constant 0 : index
    %c0_0 = arith.constant 0 : index
    %c0_1 = arith.constant 0 : index
    %0 = vector.load %arg1[%c0, %c0_0, %c0_1] : memref<16x16x32xf32, #tpu.memory_space<vmem>>, vector<16x16x32xf32>
    %1 = vector.shape_cast %0 : vector<16x16x32xf32> to vector<256x32xf32>
    %c0_2 = arith.constant 0 : index
    %c0_3 = arith.constant 0 : index
    %c0_4 = arith.constant 0 : index
    %2 = vector.load %arg2[%c0_2, %c0_3, %c0_4] : memref<16x32x32xf32, #tpu.memory_space<vmem>>, vector<16x32x32xf32>
    %3 = vector.shape_cast %2 : vector<16x32x32xf32> to vector<512x32xf32>
    %c0_5 = arith.constant 0 : index
    %c0_6 = arith.constant 0 : index
    %4 = vector.load %arg4[%c0_5, %c0_6] : memref<32x32xf32, #tpu.memory_space<vmem>>, vector<32x32xf32>
    %cst = arith.constant dense<0.000000e+00> : vector<256x32xf32>
    %5 = tpu.matmul %1, %4, %cst {dimension_numbers = #tpu.dot_dimension_numbers<[1], [0], [0], [1], [0, 0, 1, 1], [], []>} : vector<256x32xf32>, vector<32x32xf32>, vector<256x32xf32> -> vector<256x32xf32>
    %c0_7 = arith.constant 0 : index
    %c0_8 = arith.constant 0 : index
    %6 = vector.load %arg5[%c0_7, %c0_8] : memref<1x32xf32, #tpu.memory_space<vmem>>, vector<1x32xf32>
    %7 = vector.broadcast %6 : vector<1x32xf32> to vector<256x32xf32>
    %8 = arith.addf %5, %7 : vector<256x32xf32>
    %9 = vector.shape_cast %8 : vector<256x32xf32> to vector<16x16x32xf32>
    %c0_9 = arith.constant 0 : index
    %c0_10 = arith.constant 0 : index
    %10 = vector.load %arg6[%c0_9, %c0_10] : memref<32x32xf32, #tpu.memory_space<vmem>>, vector<32x32xf32>
    %cst_11 = arith.constant dense<0.000000e+00> : vector<512x32xf32>
    %11 = tpu.matmul %3, %10, %cst_11 {dimension_numbers = #tpu.dot_dimension_numbers<[1], [0], [0], [1], [0, 0, 1, 1], [], []>} : vector<512x32xf32>, vector<32x32xf32>, vector<512x32xf32> -> vector<512x32xf32>
    %c0_12 = arith.constant 0 : index
    %c0_13 = arith.constant 0 : index
    %12 = vector.load %arg7[%c0_12, %c0_13] : memref<1x32xf32, #tpu.memory_space<vmem>>, vector<1x32xf32>
    %13 = vector.broadcast %12 : vector<1x32xf32> to vector<512x32xf32>
    %14 = arith.addf %11, %13 : vector<512x32xf32>
    %15 = vector.shape_cast %14 : vector<512x32xf32> to vector<16x32x32xf32>
    %c0_14 = arith.constant 0 : index
    %16 = memref.load %arg8[%c0_14] : memref<1xf32, #tpu.memory_space<smem>>
    %cst_15 = arith.constant 1.000000e+00 : f32
    %17 = arith.divf %cst_15, %16 : f32
    %cst_16 = arith.constant dense<0.000000e+00> : vector<16x16x32xf32>
    %18 = tpu.matmul %9, %15, %cst_16 {dimension_numbers = #tpu.dot_dimension_numbers<[2], [1], [1], [2], [0, 0, 0, 1, 1, 2], [0], [0]>} : vector<16x16x32xf32>, vector<16x32x32xf32>, vector<16x16x32xf32> -> vector<16x16x32xf32>
    %19 = vector.broadcast %17 : f32 to vector<16x16x32xf32>
    %20 = arith.mulf %18, %19 : vector<16x16x32xf32>
    %cst_17 = arith.constant dense<0xFF800000> : vector<16x16xf32>
    %21 = vector.multi_reduction <maximumf>, %20, %cst_17 [2] : vector<16x16x32xf32> to vector<16x16xf32>
    %22 = vector.shape_cast %21 : vector<16x16xf32> to vector<16x16x1xf32>
    %23 = vector.broadcast %22 : vector<16x16x1xf32> to vector<16x16x32xf32>
    %24 = arith.subf %20, %23 : vector<16x16x32xf32>
    %25 = math.exp %24 : vector<16x16x32xf32>
    %cst_18 = arith.constant dense<0.000000e+00> : vector<16x16xf32>
    %26 = vector.multi_reduction <add>, %25, %cst_18 [2] : vector<16x16x32xf32> to vector<16x16xf32>
    %27 = vector.shape_cast %26 : vector<16x16xf32> to vector<16x16x1xf32>
    %c0_19 = arith.constant 0 : index
    %c0_20 = arith.constant 0 : index
    %c0_21 = arith.constant 0 : index
    %28 = vector.load %arg3[%c0_19, %c0_20, %c0_21] : memref<16x16x32xf32, #tpu.memory_space<vmem>>, vector<16x16x32xf32>
    %cst_22 = arith.constant dense<0.000000e+00> : vector<16x16x16xf32>
    %29 = tpu.matmul %25, %28, %cst_22 {dimension_numbers = #tpu.dot_dimension_numbers<[2], [2], [1], [1], [0, 0, 0, 1, 1, 1], [0], [0]>} : vector<16x16x32xf32>, vector<16x16x32xf32>, vector<16x16x16xf32> -> vector<16x16x16xf32>
    %30 = vector.broadcast %27 : vector<16x16x1xf32> to vector<16x16x16xf32>
    %31 = arith.divf %29, %30 : vector<16x16x16xf32>
    %32 = vector.extract_strided_slice %31 {offsets = [0, 0, 0], sizes = [1, 16, 16], strides = [1, 1, 1]} : vector<16x16x16xf32> to vector<1x16x16xf32>
    %33 = vector.shape_cast %32 : vector<1x16x16xf32> to vector<16x16xf32>
    %34 = vector.extract_strided_slice %31 {offsets = [1, 0, 0], sizes = [1, 16, 16], strides = [1, 1, 1]} : vector<16x16x16xf32> to vector<1x16x16xf32>
    %35 = vector.shape_cast %34 : vector<1x16x16xf32> to vector<16x16xf32>
    %36 = vector.extract_strided_slice %31 {offsets = [2, 0, 0], sizes = [1, 16, 16], strides = [1, 1, 1]} : vector<16x16x16xf32> to vector<1x16x16xf32>
    %37 = vector.shape_cast %36 : vector<1x16x16xf32> to vector<16x16xf32>
    %38 = vector.extract_strided_slice %31 {offsets = [3, 0, 0], sizes = [1, 16, 16], strides = [1, 1, 1]} : vector<16x16x16xf32> to vector<1x16x16xf32>
    %39 = vector.shape_cast %38 : vector<1x16x16xf32> to vector<16x16xf32>
    %40 = vector.extract_strided_slice %31 {offsets = [4, 0, 0], sizes = [1, 16, 16], strides = [1, 1, 1]} : vector<16x16x16xf32> to vector<1x16x16xf32>
    %41 = vector.shape_cast %40 : vector<1x16x16xf32> to vector<16x16xf32>
    %42 = vector.extract_strided_slice %31 {offsets = [5, 0, 0], sizes = [1, 16, 16], strides = [1, 1, 1]} : vector<16x16x16xf32> to vector<1x16x16xf32>
    %43 = vector.shape_cast %42 : vector<1x16x16xf32> to vector<16x16xf32>
    %44 = vector.extract_strided_slice %31 {offsets = [6, 0, 0], sizes = [1, 16, 16], strides = [1, 1, 1]} : vector<16x16x16xf32> to vector<1x16x16xf32>
    %45 = vector.shape_cast %44 : vector<1x16x16xf32> to vector<16x16xf32>
    %46 = vector.extract_strided_slice %31 {offsets = [7, 0, 0], sizes = [1, 16, 16], strides = [1, 1, 1]} : vector<16x16x16xf32> to vector<1x16x16xf32>
    %47 = vector.shape_cast %46 : vector<1x16x16xf32> to vector<16x16xf32>
    %48 = vector.extract_strided_slice %31 {offsets = [8, 0, 0], sizes = [1, 16, 16], strides = [1, 1, 1]} : vector<16x16x16xf32> to vector<1x16x16xf32>
    %49 = vector.shape_cast %48 : vector<1x16x16xf32> to vector<16x16xf32>
    %50 = vector.extract_strided_slice %31 {offsets = [9, 0, 0], sizes = [1, 16, 16], strides = [1, 1, 1]} : vector<16x16x16xf32> to vector<1x16x16xf32>
    %51 = vector.shape_cast %50 : vector<1x16x16xf32> to vector<16x16xf32>
    %52 = vector.extract_strided_slice %31 {offsets = [10, 0, 0], sizes = [1, 16, 16], strides = [1, 1, 1]} : vector<16x16x16xf32> to vector<1x16x16xf32>
    %53 = vector.shape_cast %52 : vector<1x16x16xf32> to vector<16x16xf32>
    %54 = vector.extract_strided_slice %31 {offsets = [11, 0, 0], sizes = [1, 16, 16], strides = [1, 1, 1]} : vector<16x16x16xf32> to vector<1x16x16xf32>
    %55 = vector.shape_cast %54 : vector<1x16x16xf32> to vector<16x16xf32>
    %56 = vector.extract_strided_slice %31 {offsets = [12, 0, 0], sizes = [1, 16, 16], strides = [1, 1, 1]} : vector<16x16x16xf32> to vector<1x16x16xf32>
    %57 = vector.shape_cast %56 : vector<1x16x16xf32> to vector<16x16xf32>
    %58 = vector.extract_strided_slice %31 {offsets = [13, 0, 0], sizes = [1, 16, 16], strides = [1, 1, 1]} : vector<16x16x16xf32> to vector<1x16x16xf32>
    %59 = vector.shape_cast %58 : vector<1x16x16xf32> to vector<16x16xf32>
    %60 = vector.extract_strided_slice %31 {offsets = [14, 0, 0], sizes = [1, 16, 16], strides = [1, 1, 1]} : vector<16x16x16xf32> to vector<1x16x16xf32>
    %61 = vector.shape_cast %60 : vector<1x16x16xf32> to vector<16x16xf32>
    %62 = vector.extract_strided_slice %31 {offsets = [15, 0, 0], sizes = [1, 16, 16], strides = [1, 1, 1]} : vector<16x16x16xf32> to vector<1x16x16xf32>
    %63 = vector.shape_cast %62 : vector<1x16x16xf32> to vector<16x16xf32>
    %64 = tpu.concatenate %33, %35, %37, %39, %41, %43, %45, %47, %49, %51, %53, %55, %57, %59, %61, %63 in 1 : vector<16x16xf32>, vector<16x16xf32>, vector<16x16xf32>, vector<16x16xf32>, vector<16x16xf32>, vector<16x16xf32>, vector<16x16xf32>, vector<16x16xf32>, vector<16x16xf32>, vector<16x16xf32>, vector<16x16xf32>, vector<16x16xf32>, vector<16x16xf32>, vector<16x16xf32>, vector<16x16xf32>, vector<16x16xf32> -> vector<16x256xf32>
    %c0_23 = arith.constant 0 : index
    %c0_24 = arith.constant 0 : index
    %c0_25 = arith.constant 0 : index
    %65 = vector.load %arg9[%c0_23, %c0_24, %c0_25] : memref<1x16x256xf32, #tpu.memory_space<vmem>>, vector<1x16x256xf32>
    %66 = vector.shape_cast %65 : vector<1x16x256xf32> to vector<16x256xf32>
    %67 = vector.shape_cast %64 : vector<16x256xf32> to vector<1x16x256xf32>
    tpu.vector_store %arg9[%c0_23, %c0_24, %c0_25], %67 {strides = array<i32>} : memref<1x16x256xf32, #tpu.memory_space<vmem>>, vector<1x16x256xf32>,
    return
  }
  func.func @transform_0(%arg0: i32) -> (i32, i32, i32) {
    %c0_i32 = arith.constant 0 : i32
    %c0_i32_0 = arith.constant 0 : i32
    %c0_i32_1 = arith.constant 0 : i32
    return %arg0, %c0_i32, %c0_i32_0 : i32, i32, i32
  }
  func.func @transform_1(%arg0: i32) -> (i32, i32, i32) {
    %c0_i32 = arith.constant 0 : i32
    %c0_i32_0 = arith.constant 0 : i32
    %c0_i32_1 = arith.constant 0 : i32
    return %arg0, %c0_i32, %c0_i32_0 : i32, i32, i32
  }
  func.func @transform_2(%arg0: i32) -> (i32, i32, i32) {
    %c0_i32 = arith.constant 0 : i32
    %c0_i32_0 = arith.constant 0 : i32
    %c0_i32_1 = arith.constant 0 : i32
    return %arg0, %c0_i32, %c0_i32_0 : i32, i32, i32
  }
  func.func @transform_3(%arg0: i32) -> (i32, i32) {
    %c0_i32 = arith.constant 0 : i32
    %c0_i32_0 = arith.constant 0 : i32
    %c0_i32_1 = arith.constant 0 : i32
    return %c0_i32, %c0_i32_0 : i32, i32
  }
  func.func @transform_4(%arg0: i32) -> (i32, i32) {
    %c0_i32 = arith.constant 0 : i32
    %c0_i32_0 = arith.constant 0 : i32
    %c0_i32_1 = arith.constant 0 : i32
    return %c0_i32, %c0_i32_0 : i32, i32
  }
  func.func @transform_5(%arg0: i32) -> (i32, i32) {
    %c0_i32 = arith.constant 0 : i32
    %c0_i32_0 = arith.constant 0 : i32
    %c0_i32_1 = arith.constant 0 : i32
    return %c0_i32, %c0_i32_0 : i32, i32
  }
  func.func @transform_6(%arg0: i32) -> (i32, i32) {
    %c0_i32 = arith.constant 0 : i32
    %c0_i32_0 = arith.constant 0 : i32
    %c0_i32_1 = arith.constant 0 : i32
    return %c0_i32, %c0_i32_0 : i32, i32
  }
  func.func @transform_7(%arg0: i32) -> i32 {
    %c0_i32 = arith.constant 0 : i32
    %c0_i32_0 = arith.constant 0 : i32
    return %c0_i32 : i32
  }
  func.func @transform_8(%arg0: i32) -> (i32, i32, i32) {
    %c0_i32 = arith.constant 0 : i32
    %c0_i32_0 = arith.constant 0 : i32
    %c0_i32_1 = arith.constant 0 : i32
    return %arg0, %c0_i32, %c0_i32_0 : i32, i32, i32
  }
}

</mosaic_0001>

<bundles_post_ra>
// kernel: tpu_custom_call.1
= control target key start
LH: loop header
LB: loop body
LE: loop exit
PB: predicated region body
PF: predicated region fallthrough
CT: control target
= control target key end

     0   :  { %14 = vsyncpa [#allocation4], 0  ;;  %s4767_s0 = inlined_call_operand.hbm [shape: f32[16,16,32], index: 0, kind: input, shape index: {}]   ;;  %s4768_s1 = inlined_call_operand.hbm [shape: f32[16,32,32], index: 1, kind: input, shape index: {}]   ;;  %s4769_s2 = inlined_call_operand.hbm [shape: f32[16,16,32], index: 2, kind: input, shape index: {}]   ;;  %s4770_s3 = inlined_call_operand.hbm [shape: f32[32,32], index: 3, kind: input, shape index: {}]   ;;  %s4771_s4 = inlined_call_operand.vmem [shape: f32[1,32], index: 4, kind: input, shape index: {}]   ;;  %s4772_s5 = inlined_call_operand.hbm [shape: f32[32,32], index: 5, kind: input, shape index: {}]   ;;  %s4773_s6 = inlined_call_operand.vmem [shape: f32[1,32], index: 6, kind: input, shape index: {}]   ;;  %s4774_s7 = inlined_call_operand.<no memory space> [shape: f32[1], index: 7, kind: input, shape index: {}]   ;;  %s4775_s8 = inlined_call_operand.hbm [shape: f32[1,16,256], index: 8, kind: output, shape index: {}]  }
   0x1   :  { %15 = vsyncpa [#allocation7], 0 }
   0x2   :  { %16 = vsyncpa [#allocation10], 0 }
   0x3   :  { %17 = vsyncpa [#allocation5], 0  ;;  %s35_s29 = sshll.u32 %s4768_s1, 4  ;;  %s3383_s30 = smov [#allocation6]   ;;  %s36_s29 = int_to_ptr.hbm [resolvable:$true] %s35_s29 }
   0x4   :  { %s37_s9 = sshll.u32 %s3383_s30, 4  ;;  %s61_s12 = sshll.u32 %s4770_s3, 4  ;;  %s38_s9 = int_to_ptr.vmem [resolvable:$true] %s37_s9  ;;  %s62_s12 = int_to_ptr.hbm [resolvable:$true] %s61_s12 }
   0x5   :  { %s3384_s13 = smov 128   ;;  %s3385_s14 = smov 8  }
   0x6   :  { %43 = dma.hbm_to_vmem [thread:$0]  %s36_s29, 8192, %s38_s9, [#allocation7], %s3384_s13, %s3384_s13, %s3385_s14  }
   0x7   :  { %s3386_s15 = smov [#allocation9]   ;;  %s22_s19 = sshll.u32 %s4767_s0, 4  ;;  %s23_s19 = int_to_ptr.hbm [resolvable:$true] %s22_s19 }
   0x8   :  { %s63_s16 = sshll.u32 %s3386_s15, 4  ;;  %s48_s21 = sshll.u32 %s4769_s2, 4  ;;  %s64_s16 = int_to_ptr.vmem [resolvable:$true] %s63_s16  ;;  %s49_s21 = int_to_ptr.hbm [resolvable:$true] %s48_s21 }
   0x9   :  { %69 = dma.hbm_to_vmem [thread:$0]  %s62_s12, 512, %s64_s16, [#allocation10], %s3384_s13, %s3384_s13, %s3385_s14  }
   0xa   :  { %s3387_s22 = smov [#allocation3]   ;;  %s3388_s3 = smov [#allocation8]  }
   0xb   :  { %s24_s23 = sshll.u32 %s3387_s22, 4  ;;  %s50_s24 = sshll.u32 %s3388_s3, 4  ;;  %s25_s23 = int_to_ptr.vmem [resolvable:$true] %s24_s23  ;;  %s51_s24 = int_to_ptr.vmem [resolvable:$true] %s50_s24 }
   0xc   :  { %30 = dma.hbm_to_vmem [thread:$0]  %s23_s19, 4096, %s25_s23, [#allocation4], %s3384_s13, %s3384_s13, %s3385_s14  }
   0xd   :  { %s76_s27 = sshll.u32 %s4772_s5, 4  ;;  %s3389_s0 = smov [#allocation11]   ;;  %s77_s27 = int_to_ptr.hbm [resolvable:$true] %s76_s27 }
   0xe   :  { %56 = dma.hbm_to_vmem [thread:$0]  %s49_s21, 4096, %s51_s24, [#allocation7], %s3384_s13, %s3384_s13, %s3385_s14  }
   0xf   :  { %s78_s28 = sshll.u32 %s3389_s0, 4  ;;  %s79_s28 = int_to_ptr.vmem [resolvable:$true] %s78_s28 }
  0x10   :  { %84 = dma.hbm_to_vmem [thread:$0]  %s77_s27, 512, %s79_s28, [#allocation10], %s3384_s13, %s3384_s13, %s3385_s14  }
  0x11   :  { %3375 = dma.done.wait [#allocation4], 4096  }
  0x12   :  { %3376 = vsyncadd [#allocation4], 4294963200 }
  0x13   :  { %3377 = dma.done.wait [#allocation7], 12288  }
  0x14   :  { %3378 = vsyncadd [#allocation7], 4294955008 }
  0x15   :  { %3379 = dma.done.wait [#allocation10], 1024  }
  0x16   :  { %3380 = vsyncadd [#allocation10], 4294966272  ;;  %v208_v0 = vld [vmem:[#allocation9 + $0x18] sm:$0xff]  ;;  %v207_v1 = vld [vmem:[#allocation9 + $0x10] sm:$0xff]  ;;  %vm213_vm0 = vcmask 261120   ;;  %s3390_s9 = smov 16  }
  0x17   :  { %322 = vmatpush.msra.mxu0 %v208_v0  ;;  %3069 = vmatpush.msra.mxu2 %v208_v0  ;;  %v206_v2 = vld [vmem:[#allocation9 + $0x8] sm:$0xff]  ;;  %v205_v3 = vld [vmem:[#allocation9] sm:$0xff]  ;;  %v111_v6 = vld [vmem:[#allocation3 + $0x10] sm:$0xff]  ;;  %s3391_s10 = smov 32   ;;  %s3392_s11 = smov 48  }
  0x18   :  { %3070 = vmatpush.msra.mxu3 %v208_v0  ;;  %v109_v4 = vld [vmem:[#allocation3] sm:$0xff]  ;;  %v110_v5 = vld [vmem:[#allocation3 + $0x8] sm:$0xff]  ;;  %v426_v7 = vld [vmem:[#allocation11 + $0x18] sm:$0xff]  ;;  %s3393_s12 = smov 64   ;;  %s3394_s13 = smov 96  }
  0x19   :  { %323 = vmatpush.msra.mxu0 %v207_v1  ;;  %3071 = vmatpush.msra.mxu2 %v207_v1  ;;  %v112_v8 = vld [vmem:[#allocation3 + $0x18] sm:$0xff]  ;;  %v113_v9 = vld [vmem:[#allocation3 + $0x20] sm:$0xff]  ;;  %v114_v10 = vld [vmem:[#allocation3 + $0x28] sm:$0xff]  ;;  %s3395_s14 = smov 80   ;;  %s3396_s15 = smov 112  }
  0x1a   :  { %3072 = vmatpush.msra.mxu3 %v207_v1  ;;  %3077 = vmatpush.msra.mxu1 %v426_v7  ;;  %v425_v11 = vld [vmem:[#allocation11 + $0x10] sm:$0xff]  ;;  %v424_v12 = vld [vmem:[#allocation11 + $0x8] sm:$0xff]  ;;  %v423_v13 = vld [vmem:[#allocation11] sm:$0xff]  ;;  %s2862_s18 = sshll.u32 %s4775_s8, 4  ;;  %s3397_s19 = smov [#allocation12]   ;;  %s2863_s18 = int_to_ptr.hbm [resolvable:$true] %s2862_s18 }
  0x1b   :  { %324 = vmatpush.msra.mxu0 %v206_v2  ;;  %3073 = vmatpush.msra.mxu2 %v206_v2  ;;  %v115_v14 = vld [vmem:[#allocation3 + $0x30] sm:$0xff]  ;;  %v165_v15 = vld [vmem:[#allocation6 + $0xc0] sm:$0xff]  ;;  %v116_v16 = vld [vmem:[#allocation3 + $0x38] sm:$0xff]  ;;  %s2860_s1 = sshll.u32 %s3397_s19, 4  ;;  %s3398_s20 = smov 256   ;;  %s2861_s1 = int_to_ptr.vmem [resolvable:$true] %s2860_s1 }
  0x1c   :  { %3074 = vmatpush.msra.mxu3 %v206_v2  ;;  %3078 = vmatpush.msra.mxu1 %v425_v11  ;;  %v166_v17 = vld [vmem:[#allocation6 + $0xc8] sm:$0xff]  ;;  %v117_v18 = vld [vmem:[#allocation3 + $0x40] sm:$0xff]  ;;  %v167_v19 = vld [vmem:[#allocation6 + $0xd0] sm:$0xff] }
  0x1d   :  { %325 = vmatpush.msra.mxu0 %v205_v3  ;;  %3075 = vmatpush.msra.mxu2 %v205_v3  ;;  %v118_v20 = vld [vmem:[#allocation3 + $0x48] sm:$0xff]  ;;  %v168_v21 = vld [vmem:[#allocation6 + $0xd8] sm:$0xff]  ;;  %v119_v22 = vld [vmem:[#allocation3 + $0x50] sm:$0xff] }
  0x1e   :  { %2877 = vmatmul.msk.f32.vlgmr.msra.gmra.mxu0 %vm213_vm0, %v109_v4  ;;  %3076 = vmatpush.msra.mxu3 %v205_v3  ;;  %v169_v23 = vld [vmem:[#allocation6 + $0xe0] sm:$0xff]  ;;  %v120_v24 = vld [vmem:[#allocation3 + $0x58] sm:$0xff]  ;;  %v170_v25 = vld [vmem:[#allocation6 + $0xe8] sm:$0xff] }
  0x1f   :  { %635 = vmatpush.msrb.mxu0 %v426_v7  ;;  %3079 = vmatpush.msra.mxu1 %v424_v12  ;;  %v121_v26 = vld [vmem:[#allocation3 + $0x60] sm:$0xff]  ;;  %v171_v27 = vld [vmem:[#allocation6 + $0xf0] sm:$0xff]  ;;  %v122_v28 = vld [vmem:[#allocation3 + $0x68] sm:$0xff] }
  0x20   :  { %v172_v29 = vld [vmem:[#allocation6 + $0xf8] sm:$0xff]  ;;  %v123_v30 = vld [vmem:[#allocation3 + $0x70] sm:$0xff]  ;;  %v173_v31 = vld [vmem:[#allocation6 + $0x100] sm:$0xff] }
  0x21   :  { %636 = vmatpush.msrb.mxu0 %v425_v11  ;;  %3080 = vmatpush.msra.mxu1 %v423_v13  ;;  %v124_v32 = vld [vmem:[#allocation3 + $0x78] sm:$0xff]  ;;  %v174_v33 = vld [vmem:[#allocation6 + $0x108] sm:$0xff]  ;;  %v141_v35 = vld [vmem:[#allocation6] sm:$0xff] }
  0x22   :  { %2933 = vmatmul.msk.f32.vlgmr.msra.gmra.mxu1 %vm213_vm0, %v165_v15  ;;  %v175_v36 = vld [vmem:[#allocation6 + $0x110] sm:$0xff]  ;;  %v142_v38 = vld [vmem:[#allocation6 + $0x8] sm:$0xff]  ;;  %v176_v39 = vld [vmem:[#allocation6 + $0x118] sm:$0xff] }
  0x23   :  { %637 = vmatpush.msrb.mxu0 %v424_v12  ;;  %v143_v41 = vld [vmem:[#allocation6 + $0x10] sm:$0xff]  ;;  %v177_v42 = vld [vmem:[#allocation6 + $0x120] sm:$0xff]  ;;  %v144_v44 = vld [vmem:[#allocation6 + $0x18] sm:$0xff] }
  0x24   :  { %v178_v45 = vld [vmem:[#allocation6 + $0x128] sm:$0xff]  ;;  %v145_v47 = vld [vmem:[#allocation6 + $0x20] sm:$0xff]  ;;  %v179_v48 = vld [vmem:[#allocation6 + $0x130] sm:$0xff] }
  0x25   :  { %638 = vmatpush.msrb.mxu0 %v423_v13  ;;  %v146_v50 = vld [vmem:[#allocation6 + $0x28] sm:$0xff]  ;;  %v180_v51 = vld [vmem:[#allocation6 + $0x138] sm:$0xff]  ;;  %v147_v53 = vld [vmem:[#allocation6 + $0x30] sm:$0xff] }
  0x26   :  { %2878 = vmatmul.msk.f32.gmra.mxu0 %vm213_vm0, %v110_v5  ;;  %v181_v55 = vld [vmem:[#allocation6 + $0x140] sm:$0xff]  ;;  %v148_v57 = vld [vmem:[#allocation6 + $0x38] sm:$0xff]  ;;  %v182_v59 = vld [vmem:[#allocation6 + $0x148] sm:$0xff] }
  0x27   :  { %v149_v61 = vld [vmem:[#allocation6 + $0x40] sm:$0xff]  ;;  %v183_v0 = vld [vmem:[#allocation6 + $0x150] sm:$0xff]  ;;  %v150_v2 = vld [vmem:[#allocation6 + $0x48] sm:$0xff] }
  0x28   :  { %v125_v63 = vld [vmem:[#allocation3 + $0x80] sm:$0xff]  ;;  %v126_v4 = vld [vmem:[#allocation3 + $0x88] sm:$0xff]  ;;  %v184_v5 = vld [vmem:[#allocation6 + $0x158] sm:$0xff] }
  0x29   :  { %2893 = vmatmul.msk.f32.vlgmr.msra.gmra.mxu2 %vm213_vm0, %v125_v63  ;;  %v151_v7 = vld [vmem:[#allocation6 + $0x50] sm:$0xff]  ;;  %v152_v12 = vld [vmem:[#allocation6 + $0x58] sm:$0xff]  ;;  %v186_v15 = vld [vmem:[#allocation6 + $0x168] sm:$0xff] }
  0x2a   :  { %2934 = vmatmul.msk.f32.gmra.mxu1 %vm213_vm0, %v166_v17  ;;  %v153_v17 = vld [vmem:[#allocation6 + $0x60] sm:$0xff]  ;;  %v159_v63 = vld [vmem:[#allocation6 + $0x90] sm:$0xff] }
  0x2e   :  { %2879 = vmatmul.msk.f32.gmra.mxu0 %vm213_vm0, %v111_v6 }
  0x31   :  { %2894 = vmatmul.msk.f32.gmra.mxu2 %vm213_vm0, %v126_v4  ;;  %v193_v4 = vld [vmem:[#allocation6 + $0x1a0] sm:$0xff] }
  0x32   :  { %2935 = vmatmul.msk.f32.gmra.mxu1 %vm213_vm0, %v167_v19  ;;  %v129_v19 = vld [vmem:[#allocation3 + $0xa0] sm:$0xff] }
  0x36   :  { %2880 = vmatmul.msk.f32.gmra.mxu0 %vm213_vm0, %v112_v8 }
  0x3a   :  { %2936 = vmatmul.msk.f32.gmra.mxu1 %vm213_vm0, %v168_v21  ;;  %v187_v21 = vld [vmem:[#allocation6 + $0x170] sm:$0xff] }
  0x3e   :  { %2881 = vmatmul.msk.f32.gmra.mxu0 %vm213_vm0, %v113_v9  ;;  %v127_v9 = vld [vmem:[#allocation3 + $0x90] sm:$0xff] }
  0x3f   :  { %2895 = vmatmul.msk.f32.gmra.mxu2 %vm213_vm0, %v127_v9  ;;  %v160_v9 = vld [vmem:[#allocation6 + $0x98] sm:$0xff] }
  0x42   :  { %2937 = vmatmul.msk.f32.gmra.mxu1 %vm213_vm0, %v169_v23  ;;  %v154_v23 = vld [vmem:[#allocation6 + $0x68] sm:$0xff] }
  0x46   :  { %2882 = vmatmul.msk.f32.gmra.mxu0 %vm213_vm0, %v114_v10  ;;  %v185_v10 = vld [vmem:[#allocation6 + $0x160] sm:$0xff] }
  0x4a   :  { %2938 = vmatmul.msk.f32.gmra.mxu1 %vm213_vm0, %v170_v25  ;;  %v130_v25 = vld [vmem:[#allocation3 + $0xa8] sm:$0xff] }
  0x4e   :  { %2883 = vmatmul.msk.f32.gmra.mxu0 %vm213_vm0, %v115_v14  ;;  %v128_v14 = vld [vmem:[#allocation3 + $0x98] sm:$0xff] }
  0x4f   :  { %2896 = vmatmul.msk.f32.gmra.mxu2 %vm213_vm0, %v128_v14  ;;  %v140_v14 = vld [vmem:[#allocation3 + $0xf8] sm:$0xff] }
  0x52   :  { %2939 = vmatmul.msk.f32.gmra.mxu1 %vm213_vm0, %v171_v27  ;;  %v188_v27 = vld [vmem:[#allocation6 + $0x178] sm:$0xff] }
  0x56   :  { %2884 = vmatmul.msk.f32.gmra.mxu0 %vm213_vm0, %v116_v16 }
  0x57   :  { %2897 = vmatmul.msk.f32.gmra.mxu2 %vm213_vm0, %v129_v19  ;;  %v3610_v19 = vld [vmem:[%s4771_s4] ss:$0 sm:$0xff] }
  0x5a   :  { %2940 = vmatmul.msk.f32.gmra.mxu1 %vm213_vm0, %v172_v29  ;;  %v155_v29 = vld [vmem:[#allocation6 + $0x70] sm:$0xff] }
  0x5e   :  { %2885 = vmatmul.msk.f32.gmra.mxu0 %vm213_vm0, %v117_v18 }
  0x5f   :  { %2898 = vmatmul.msk.f32.gmra.mxu2 %vm213_vm0, %v130_v25 }
  0x62   :  { %2941 = vmatmul.msk.f32.gmra.mxu1 %vm213_vm0, %v173_v31  ;;  %v131_v31 = vld [vmem:[#allocation3 + $0xb0] sm:$0xff] }
  0x66   :  { %2886 = vmatmul.msk.f32.gmra.mxu0 %vm213_vm0, %v118_v20  ;;  %v133_v20 = vld [vmem:[#allocation3 + $0xc0] sm:$0xff] }
  0x67   :  { %2901 = vmatmul.msk.f32.vlgmr.msra.gmra.mxu3 %vm213_vm0, %v133_v20  ;;  %2899 = vmatmul.msk.f32.gmra.mxu2 %vm213_vm0, %v131_v31 }
  0x6a   :  { %2942 = vmatmul.msk.f32.gmra.mxu1 %vm213_vm0, %v174_v33  ;;  %v189_v33 = vld [vmem:[#allocation6 + $0x180] sm:$0xff] }
  0x6e   :  { %2887 = vmatmul.msk.f32.gmra.mxu0 %vm213_vm0, %v119_v22 }
  0x72   :  { %2943 = vmatmul.msk.f32.gmra.mxu1 %vm213_vm0, %v175_v36  ;;  %v156_v36 = vld [vmem:[#allocation6 + $0x78] sm:$0xff] }
  0x76   :  { %2888 = vmatmul.msk.f32.gmra.mxu0 %vm213_vm0, %v120_v24 }
  0x7a   :  { %2944 = vmatmul.msk.f32.gmra.mxu1 %vm213_vm0, %v176_v39  ;;  %v132_v39 = vld [vmem:[#allocation3 + $0xb8] sm:$0xff] }
  0x7b   :  { %2900 = vmatmul.msk.f32.gmra.mxu2 %vm213_vm0, %v132_v39 }
  0x7e   :  { %2889 = vmatmul.msk.f32.gmra.mxu0 %vm213_vm0, %v121_v26  ;;  %v134_v26 = vld [vmem:[#allocation3 + $0xc8] sm:$0xff] }
  0x7f   :  { %2902 = vmatmul.msk.f32.gmra.mxu3 %vm213_vm0, %v134_v26  ;;  %v161_v26 = vld [vmem:[#allocation6 + $0xa0] sm:$0xff] }
  0x82   :  { %2945 = vmatmul.msk.f32.gmra.mxu1 %vm213_vm0, %v177_v42  ;;  %v190_v42 = vld [vmem:[#allocation6 + $0x188] sm:$0xff] }
  0x86   :  { %2890 = vmatmul.msk.f32.gmra.mxu0 %vm213_vm0, %v122_v28 }
  0x8a   :  { %2946 = vmatmul.msk.f32.gmra.mxu1 %vm213_vm0, %v178_v45  ;;  %v157_v45 = vld [vmem:[#allocation6 + $0x80] sm:$0xff] }
  0x8e   :  { %2891 = vmatmul.msk.f32.gmra.mxu0 %vm213_vm0, %v123_v30 }
  0x92   :  { %2947 = vmatmul.msk.f32.gmra.mxu1 %vm213_vm0, %v179_v48  ;;  %v137_v48 = vld [vmem:[#allocation3 + $0xe0] sm:$0xff] }
  0x96   :  { %2892 = vmatmul.msk.f32.gmra.mxu0 %vm213_vm0, %v124_v32  ;;  %v135_v32 = vld [vmem:[#allocation3 + $0xd0] sm:$0xff] }
  0x97   :  { %2903 = vmatmul.msk.f32.gmra.mxu3 %vm213_vm0, %v135_v32 }
  0x9a   :  { %2948 = vmatmul.msk.f32.gmra.mxu1 %vm213_vm0, %v180_v51 }
  0x9b   :  { %v3485_v34 = vpop.f32.mrf.mxu0 }
  0x9e   :  { %2909 = vmatmul.msk.f32.vlgmr.msrb.gmra.mxu0 %vm213_vm0, %v141_v35 }
  0x9f   :  { %v3511_v54 = vpop.f32.mrf.mxu1 }
  0xa2   :  { %2949 = vmatmul.msk.f32.gmra.mxu1 %vm213_vm0, %v181_v55 }
  0xa3   :  { %v3489_v37 = vpop.f32.mrf.mxu0 }
  0xa4   :  { %v331_v31 = vadd.f32 %v3610_v19, %v3489_v37 }
  0xa6   :  { %2910 = vmatmul.msk.f32.gmra.mxu0 %vm213_vm0, %v142_v38 }
  0xa7   :  { %v3517_v58 = vpop.f32.mrf.mxu1 }
  0xaa   :  { %2950 = vmatmul.msk.f32.gmra.mxu1 %vm213_vm0, %v182_v59  ;;  %v192_v59 = vld [vmem:[#allocation6 + $0x198] sm:$0xff] }
  0xab   :  { %v3493_v40 = vpop.f32.mrf.mxu0 }
  0xae   :  { %2911 = vmatmul.msk.f32.gmra.mxu0 %vm213_vm0, %v143_v41  ;;  %v136_v41 = vld [vmem:[#allocation3 + $0xd8] sm:$0xff] }
  0xaf   :  { %v3523_v62 = vpop.f32.mrf.mxu1  ;;  %2904 = vmatmul.msk.f32.gmra.mxu3 %vm213_vm0, %v136_v41  ;;  %v163_v41 = vld [vmem:[#allocation6 + $0xb0] sm:$0xff] }
  0xb2   :  { %2951 = vmatmul.msk.f32.gmra.mxu1 %vm213_vm0, %v183_v0 }
  0xb3   :  { %v3497_v43 = vpop.f32.mrf.mxu0 }
  0xb6   :  { %2912 = vmatmul.msk.f32.gmra.mxu0 %vm213_vm0, %v144_v44 }
  0xb7   :  { %v3530_v3 = vpop.f32.mrf.mxu1  ;;  %2905 = vmatmul.msk.f32.gmra.mxu3 %vm213_vm0, %v137_v48 }
  0xba   :  { %2952 = vmatmul.msk.f32.gmra.mxu1 %vm213_vm0, %v184_v5  ;;  %v3599_v5 = vld [vmem:[%s4773_s6] ss:$0 sm:$0xff] }
  0xbb   :  { %v3501_v46 = vpop.f32.mrf.mxu0 }
  0xbe   :  { %2913 = vmatmul.msk.f32.gmra.mxu0 %vm213_vm0, %v145_v47 }
  0xbf   :  { %v3537_v8 = vpop.f32.mrf.mxu1 }
  0xc2   :  { %2953 = vmatmul.msk.f32.gmra.mxu1 %vm213_vm0, %v185_v10 }
  0xc3   :  { %v3505_v49 = vpop.f32.mrf.mxu0 }
  0xc6   :  { %2914 = vmatmul.msk.f32.gmra.mxu0 %vm213_vm0, %v146_v50  ;;  %v191_v50 = vld [vmem:[#allocation6 + $0x190] sm:$0xff] }
  0xc7   :  { %v3544_v13 = vpop.f32.mrf.mxu1 }
  0xca   :  { %2954 = vmatmul.msk.f32.gmra.mxu1 %vm213_vm0, %v186_v15  ;;  %v194_v15 = vld [vmem:[#allocation6 + $0x1a8] sm:$0xff] }
  0xcb   :  { %v3509_v52 = vpop.f32.mrf.mxu0 }
  0xce   :  { %2915 = vmatmul.msk.f32.gmra.mxu0 %vm213_vm0, %v147_v53  ;;  %v158_v53 = vld [vmem:[#allocation6 + $0x88] sm:$0xff] }
  0xcf   :  { %v3551_v18 = vpop.f32.mrf.mxu1 }
  0xd2   :  { %2955 = vmatmul.msk.f32.gmra.mxu1 %vm213_vm0, %v187_v21 }
  0xd3   :  { %v3515_v56 = vpop.f32.mrf.mxu0 }
  0xd6   :  { %2916 = vmatmul.msk.f32.gmra.mxu0 %vm213_vm0, %v148_v57  ;;  %v138_v57 = vld [vmem:[#allocation3 + $0xe8] sm:$0xff] }
  0xd7   :  { %v3559_v24 = vpop.f32.mrf.mxu1  ;;  %2906 = vmatmul.msk.f32.gmra.mxu3 %vm213_vm0, %v138_v57 }
  0xda   :  { %2956 = vmatmul.msk.f32.gmra.mxu1 %vm213_vm0, %v188_v27 }
  0xdb   :  { %v3521_v60 = vpop.f32.mrf.mxu0 }
  0xde   :  { %2917 = vmatmul.msk.f32.gmra.mxu0 %vm213_vm0, %v149_v61 }
  0xdf   :  { %v3567_v30 = vpop.f32.mrf.mxu1 }
  0xe2   :  { %2957 = vmatmul.msk.f32.gmra.mxu1 %vm213_vm0, %v189_v33  ;;  %v162_v33 = vld [vmem:[#allocation6 + $0xa8] sm:$0xff] }
  0xe3   :  { %v3528_v1 = vpop.f32.mrf.mxu0 }
  0xe6   :  { %2918 = vmatmul.msk.f32.gmra.mxu0 %vm213_vm0, %v150_v2  ;;  %v139_v2 = vld [vmem:[#allocation3 + $0xf0] sm:$0xff] }
  0xe7   :  { %v3575_v38 = vpop.f32.mrf.mxu1  ;;  %2907 = vmatmul.msk.f32.gmra.mxu3 %vm213_vm0, %v139_v2 }
  0xea   :  { %2958 = vmatmul.msk.f32.gmra.mxu1 %vm213_vm0, %v190_v42 }
  0xeb   :  { %v3535_v6 = vpop.f32.mrf.mxu0 }
  0xee   :  { %2919 = vmatmul.msk.f32.gmra.mxu0 %vm213_vm0, %v151_v7 }
  0xef   :  { %v3581_v47 = vpop.f32.mrf.mxu1  ;;  %2908 = vmatmul.msk.f32.gmra.mxu3 %vm213_vm0, %v140_v14 }
  0xf2   :  { %2959 = vmatmul.msk.f32.gmra.mxu1 %vm213_vm0, %v191_v50 }
  0xf3   :  { %v3542_v11 = vpop.f32.mrf.mxu0 }
  0xf6   :  { %2920 = vmatmul.msk.f32.gmra.mxu0 %vm213_vm0, %v152_v12 }
  0xf7   :  { %v3586_v55 = vpop.f32.mrf.mxu1 }
  0xfa   :  { %2960 = vmatmul.msk.f32.gmra.mxu1 %vm213_vm0, %v192_v59 }
  0xfb   :  { %v3549_v16 = vpop.f32.mrf.mxu0 }
  0xfe   :  { %2921 = vmatmul.msk.f32.gmra.mxu0 %vm213_vm0, %v153_v17 }
  0xff   :  { %v3591_v0 = vpop.f32.mrf.mxu1 }
 0x102   :  { %2961 = vmatmul.msk.f32.gmra.mxu1 %vm213_vm0, %v193_v4  ;;  %v833_v4 = vstv %s4774_s7 }
 0x103   :  { %v3557_v22 = vpop.f32.mrf.mxu0  ;;  %3101 = vrcp.f32 %v833_v4  ;;  %vm839_vm1 = vweird.f32 %v833_v4 }
 0x106   :  { %2922 = vmatmul.msk.f32.gmra.mxu0 %vm213_vm0, %v154_v23  ;;  %v328_v23 = vadd.f32 %v3610_v19, %v3485_v34  ;;  %v196_v34 = vld [vmem:[#allocation6 + $0x1b8] sm:$0xff] }
 0x107   :  { %v3601_v10 = vpop.f32.mrf.mxu1 }
 0x10a   :  { %2962 = vmatmul.msk.f32.gmra.mxu1 %vm213_vm0, %v194_v15 }
 0x10b   :  { %v3565_v28 = vpop.f32.mrf.mxu0 }
 0x10e   :  { %2923 = vmatmul.msk.f32.gmra.mxu0 %vm213_vm0, %v155_v29  ;;  %v195_v29 = vld [vmem:[#allocation6 + $0x1b0] sm:$0xff] }
 0x10f   :  { %v3617_v27 = vpop.f32.mrf.mxu1 }
 0x112   :  { %2963 = vmatmul.msk.f32.gmra.mxu1 %vm213_vm0, %v195_v29 }
 0x113   :  { %v3573_v35 = vpop.f32.mrf.mxu0 }
 0x116   :  { %2924 = vmatmul.msk.f32.gmra.mxu0 %vm213_vm0, %v156_v36 }
 0x117   :  { %v3624_v36 = vpop.f32.mrf.mxu1 }
 0x11a   :  { %2964 = vmatmul.msk.f32.gmra.mxu1 %vm213_vm0, %v196_v34 }
 0x11b   :  { %v640_v44 = vpop.f32.mrf.mxu0 }
 0x11c   :  { %v641_v21 = vadd.f32 %v3599_v5, %v640_v44  ;;  %v197_v44 = vld [vmem:[#allocation6 + $0x1c0] sm:$0xff] }
 0x11e   :  { %2925 = vmatmul.msk.f32.gmra.mxu0 %vm213_vm0, %v157_v45  ;;  %v164_v45 = vld [vmem:[#allocation6 + $0xb8] sm:$0xff] }
 0x11f   :  { %v3629_v42 = vpop.f32.mrf.mxu1 }
 0x122   :  { %2965 = vmatmul.msk.f32.gmra.mxu1 %vm213_vm0, %v197_v44 }
 0x123   :  { %v643_v51 = vpop.f32.mrf.mxu0 }
 0x124   :  { %v644_v20 = vadd.f32 %v3599_v5, %v643_v51  ;;  %v198_v51 = vld [vmem:[#allocation6 + $0x1c8] sm:$0xff] }
 0x126   :  { %2926 = vmatmul.msk.f32.gmra.mxu0 %vm213_vm0, %v158_v53 }
 0x127   :  { %v3633_v48 = vpop.f32.mrf.mxu1 }
 0x12a   :  { %2966 = vmatmul.msk.f32.gmra.mxu1 %vm213_vm0, %v198_v51 }
 0x12b   :  { %v646_v61 = vpop.f32.mrf.mxu0 }
 0x12c   :  { %v647_v17 = vadd.f32 %v3599_v5, %v646_v61  ;;  %v334_v61 = vadd.f32 %v3610_v19, %v3493_v40 }
 0x12e   :  { %2927 = vmatmul.msk.f32.gmra.mxu0 %vm213_vm0, %v159_v63 }
 0x12f   :  { %v3643_v2 = vpop.f32.mrf.mxu1 }
 0x133   :  { %v649_v7 = vpop.f32.mrf.mxu0 }
 0x134   :  { %v650_v12 = vadd.f32 %v3599_v5, %v649_v7  ;;  %v199_v7 = vld [vmem:[#allocation6 + $0x1d0] sm:$0xff] }
 0x135   :  { %2967 = vmatmul.msk.f32.gmra.mxu1 %vm213_vm0, %v199_v7  ;;  %v203_v7 = vld [vmem:[#allocation6 + $0x1f0] sm:$0xff] }
 0x136   :  { %2928 = vmatmul.msk.f32.gmra.mxu0 %vm213_vm0, %v160_v9  ;;  %867 = vmatpush.msrb.mxu2 %v650_v12  ;;  %v3102_v9 = vpop.eup %3101  ;;  %v337_v12 = vadd.f32 %v3610_v19, %v3497_v43 }
 0x137   :  { %v3652_v40 = vpop.f32.mrf.mxu1  ;;  %v835_v15 = vmul.f32 %v3102_v9, %v833_v4  ;;  %vm840_vm2 = vweird.f32 %v3102_v9 }
 0x138   :  { %868 = vmatpush.msrb.mxu2 %v647_v17  ;;  %v200_v17 = vld [vmem:[#allocation6 + $0x1d8] sm:$0xff]  ;;  %vm841_vm3 = vmor %vm839_vm1, %vm840_vm2 }
 0x13a   :  { %869 = vmatpush.msrb.mxu2 %v644_v20  ;;  %v836_v20 = vsub.f32 1.0, %v835_v15 }
 0x13b   :  { %v652_v25 = vpop.f32.mrf.mxu0 }
 0x13c   :  { %870 = vmatpush.msrb.mxu2 %v641_v21  ;;  %v653_v59 = vadd.f32 %v3599_v5, %v652_v25  ;;  %v837_v21 = vmul.f32 %v3102_v9, %v836_v20 }
 0x13d   :  { %2973 = vmatmul.msk.f32.vlgmr.msrb.gmra.mxu2 %vm213_vm0, %v328_v23  ;;  %2968 = vmatmul.msk.f32.gmra.mxu1 %vm213_vm0, %v200_v17  ;;  %v845_v23 = vand.u32 2147483648, %v833_v4 }
 0x13e   :  { %2929 = vmatmul.msk.f32.gmra.mxu0 %vm213_vm0, %v161_v26  ;;  %v838_v25 = vadd.f32 %v3102_v9, %v837_v21  ;;  %v843_v26 = vand.u32 2147483647, %v833_v4  ;;  %v3688_v21 = vpop.f32.mrf.mxu3 }
 0x13f   :  { %v846_v43 = vor.u32 1.1754944e-38, %v845_v23 }
 0x140   :  { %vm844_vm4 = vcmp.eq.f32.partialorder %v843_v26, 8.507059e+37 }
 0x143   :  { %v655_v32 = vpop.f32.mrf.mxu0 }
 0x144   :  { %v656_v57 = vadd.f32 %v3599_v5, %v655_v32  ;;  %v201_v32 = vld [vmem:[#allocation6 + $0x1e0] sm:$0xff] }
 0x145   :  { %2974 = vmatmul.msk.f32.gmra.mxu2 %vm213_vm0, %v331_v31  ;;  %v3656_v31 = vpop.f32.mrf.mxu1  ;;  %2969 = vmatmul.msk.f32.gmra.mxu1 %vm213_vm0, %v201_v32 }
 0x146   :  { %2930 = vmatmul.msk.f32.gmra.mxu0 %vm213_vm0, %v162_v33  ;;  %v842_v33 = vsel %vm841_vm3, %v3102_v9, %v838_v25  ;;  %v343_v9 = vadd.f32 %v3610_v19, %v3505_v49 }
 0x147   :  { %v847_v34 = vsel %vm844_vm4, %v846_v43, %v842_v33  ;;  %v3698_v33 = vpop.f32.mrf.mxu3 }
 0x148   :  { %3081 = vpush %v847_v34  ;;  %v346_v34 = vadd.f32 %v3610_v19, %v3509_v52 }
 0x14b   :  { %v658_v39 = vpop.f32.mrf.mxu0 }
 0x14c   :  { %v659_v53 = vadd.f32 %v3599_v5, %v658_v39  ;;  %v3659_v39 = vpop.f32.mrf.mxu2 }
 0x14d   :  { %v3661_v44 = vpop.f32.mrf.mxu1 }
 0x14e   :  { %2931 = vmatmul.msk.f32.gmra.mxu0 %vm213_vm0, %v163_v41 }
 0x153   :  { %v661_v37 = vpop.f32.mrf.mxu0 }
 0x154   :  { %v662_v50 = vadd.f32 %v3599_v5, %v661_v37 }
 0x155   :  { %v3672_v4 = vpop.f32.mrf.mxu1 }
 0x156   :  { %2932 = vmatmul.msk.f32.gmra.mxu0 %vm213_vm0, %v164_v45  ;;  %896 = vmatpush.msrb.mxu3 %v662_v50  ;;  %v202_v45 = vld [vmem:[#allocation6 + $0x1e8] sm:$0xff] }
 0x157   :  { %2970 = vmatmul.msk.f32.gmra.mxu1 %vm213_vm0, %v202_v45 }
 0x158   :  { %897 = vmatpush.msrb.mxu3 %v659_v53 }
 0x15a   :  { %898 = vmatpush.msrb.mxu3 %v656_v57  ;;  %v3668_v57 = vpop.f32.mrf.mxu2 }
 0x15b   :  { %v664_v63 = vpop.f32.mrf.mxu0 }
 0x15c   :  { %899 = vmatpush.msrb.mxu3 %v653_v59  ;;  %v665_v53 = vadd.f32 %v3599_v5, %v664_v63  ;;  %v340_v59 = vadd.f32 %v3610_v19, %v3501_v46  ;;  %v204_v46 = vld [vmem:[#allocation6 + $0x1f8] sm:$0xff] }
 0x15d   :  { %2975 = vmatmul.msk.f32.vlgmr.msrb.gmra.mxu3 %vm213_vm0, %v334_v61  ;;  %v3678_v63 = vpop.f32.mrf.mxu1 }
 0x15f   :  { %2971 = vmatmul.msk.f32.gmra.mxu1 %vm213_vm0, %v203_v7 }
 0x163   :  { %v667_v14 = vpop.f32.mrf.mxu0 }
 0x164   :  { %v668_v51 = vadd.f32 %v3599_v5, %v667_v14  ;;  %v3680_v14 = vpop.f32.mrf.mxu2 }
 0x165   :  { %2976 = vmatmul.msk.f32.gmra.mxu3 %vm213_vm0, %v337_v12  ;;  %v3684_v17 = vpop.f32.mrf.mxu1 }
 0x167   :  { %2972 = vmatmul.msk.f32.gmra.mxu1 %vm213_vm0, %v204_v46 }
 0x16b   :  { %v670_v29 = vpop.f32.mrf.mxu0 }
 0x16c   :  { %v671_v50 = vadd.f32 %v3599_v5, %v670_v29  ;;  %v3686_v20 = vpop.f32.mrf.mxu2 }
 0x16d   :  { %v3690_v25 = vpop.f32.mrf.mxu1 }
 0x173   :  { %v673_v41 = vpop.f32.mrf.mxu0 }
 0x174   :  { %v674_v37 = vadd.f32 %v3599_v5, %v673_v41  ;;  %v3695_v43 = vpop.f32.mrf.mxu2 }
 0x176   :  { %925 = vmatpush.msra.mxu2 %v674_v37  ;;  %v3702_v37 = vpop.f32.mrf.mxu1 }
 0x178   :  { %926 = vmatpush.msra.mxu2 %v671_v50  ;;  %v349_v50 = vadd.f32 %v3610_v19, %v3515_v56 }
 0x179   :  { %s3082_s7 = spop %3081 }
 0x17a   :  { %927 = vmatpush.msra.mxu2 %v668_v51 }
 0x17b   :  { %v676_v61 = vpop.f32.mrf.mxu0 }
 0x17c   :  { %928 = vmatpush.msra.mxu2 %v665_v53  ;;  %v677_v32 = vadd.f32 %v3599_v5, %v676_v61  ;;  %v3705_v45 = vpop.f32.mrf.mxu2  ;;  %v3709_v53 = vpop.f32.mrf.mxu3 }
 0x17d   :  { %2977 = vmatmul.msk.f32.vlgmr.msra.gmra.mxu2 %vm213_vm0, %v340_v59 }
 0x17e   :  { %v3711_v59 = vpop.f32.mrf.mxu1 }
 0x183   :  { %v679_v12 = vpop.f32.mrf.mxu0 }
 0x184   :  { %v680_v29 = vadd.f32 %v3599_v5, %v679_v12  ;;  %v3714_v52 = vpop.f32.mrf.mxu2 }
 0x185   :  { %2978 = vmatmul.msk.f32.gmra.mxu2 %vm213_vm0, %v343_v9  ;;  %v3718_v9 = vpop.f32.mrf.mxu3 }
 0x186   :  { %v3716_v7 = vpop.f32.mrf.mxu1 }
 0x18b   :  { %v682_v15 = vpop.f32.mrf.mxu0 }
 0x18c   :  { %v683_v26 = vadd.f32 %v3599_v5, %v682_v15 }
 0x18e   :  { %v3721_v15 = vpop.f32.mrf.mxu1 }
 0x193   :  { %v685_v23 = vpop.f32.mrf.mxu0 }
 0x194   :  { %v686_v49 = vadd.f32 %v3599_v5, %v685_v23  ;;  %v3724_v23 = vpop.f32.mrf.mxu2 }
 0x196   :  { %954 = vmatpush.msra.mxu3 %v686_v49 }
 0x198   :  { %955 = vmatpush.msra.mxu3 %v683_v26  ;;  %v3727_v26 = vpop.f32.mrf.mxu3 }
 0x19a   :  { %956 = vmatpush.msra.mxu3 %v680_v29 }
 0x19b   :  { %v688_v41 = vpop.f32.mrf.mxu0 }
 0x19c   :  { %957 = vmatpush.msra.mxu3 %v677_v32  ;;  %v689_v29 = vadd.f32 %v3599_v5, %v688_v41  ;;  %v352_v32 = vadd.f32 %v3610_v19, %v3521_v60  ;;  %v716_v41 = vadd.f32 %v3599_v5, %v3517_v58  ;;  %v355_v58 = vadd.f32 %v3610_v19, %v3528_v1 }
 0x19d   :  { %2979 = vmatmul.msk.f32.vlgmr.msra.gmra.mxu3 %vm213_vm0, %v346_v34 }
 0x1a3   :  { %v691_v51 = vpop.f32.mrf.mxu0 }
 0x1a4   :  { %v692_v49 = vadd.f32 %v3599_v5, %v691_v51  ;;  %v719_v51 = vadd.f32 %v3599_v5, %v3523_v62  ;;  %v746_v62 = vadd.f32 %v3599_v5, %v3586_v55  ;;  %v740_v55 = vadd.f32 %v3599_v5, %v3575_v38 }
 0x1a5   :  { %2980 = vmatmul.msk.f32.gmra.mxu3 %vm213_vm0, %v349_v50  ;;  %v722_v50 = vadd.f32 %v3599_v5, %v3530_v3  ;;  %v713_v3 = vadd.f32 %v3599_v5, %v3511_v54  ;;  %v743_v54 = vadd.f32 %v3599_v5, %v3581_v47 }
 0x1ab   :  { %v694_v61 = vpop.f32.mrf.mxu0 }
 0x1ac   :  { %v695_v56 = vadd.f32 %v3599_v5, %v694_v61  ;;  %v3734_v61 = vpop.f32.mrf.mxu1 }
 0x1b3   :  { %v697_v12 = vpop.f32.mrf.mxu0 }
 0x1b4   :  { %v698_v46 = vadd.f32 %v3599_v5, %v697_v12  ;;  %v3739_v12 = vstv %s3082_s7 }
 0x1b6   :  { %983 = vmatpush.msrb.mxu2 %v698_v46 }
 0x1b8   :  { %984 = vmatpush.msrb.mxu2 %v695_v56  ;;  %v3748_v56 = vpop.f32.mrf.mxu3 }
 0x1ba   :  { %985 = vmatpush.msrb.mxu2 %v692_v49 }
 0x1bb   :  { %v700_v34 = vpop.f32.mrf.mxu0 }
 0x1bc   :  { %986 = vmatpush.msrb.mxu2 %v689_v29 }
 0x1bd   :  { %2981 = vmatmul.msk.f32.vlgmr.msrb.gmra.mxu2 %vm213_vm0, %v352_v32  ;;  %v3756_v32 = vpop.f32.mrf.mxu1 }
 0x1be   :  { %1041 = vmatpush.msra.mxu2 %v722_v50 }
 0x1c0   :  { %1042 = vmatpush.msra.mxu2 %v719_v51  ;;  %v872_v60 = vpop.f32.mrf.mxu2  ;;  %v737_v51 = vadd.f32 %v3599_v5, %v3567_v30  ;;  %v770_v30 = vadd.f32 %v3599_v5, %v3652_v40 }
 0x1c1   :  { %v3744_v46 = vmul.f32 %v3739_v12, %v872_v60  ;;  %v364_v60 = vadd.f32 %v3610_v19, %v3549_v16  ;;  %v761_v16 = vadd.f32 %v3599_v5, %v3629_v42  ;;  %v701_v42 = vadd.f32 %v3599_v5, %v700_v34 }
 0x1c2   :  { %1043 = vmatpush.msra.mxu2 %v716_v41  ;;  %v731_v34 = vadd.f32 %v3599_v5, %v3551_v18  ;;  %v725_v18 = vadd.f32 %v3599_v5, %v3537_v8 }
 0x1c3   :  { %v703_v49 = vpop.f32.mrf.mxu0  ;;  %v1346_v29 = vsel %vm213_vm0, %v3744_v46, -inf }
 0x1c4   :  { %1044 = vmatpush.msra.mxu2 %v713_v3  ;;  %1347 = vmax.xlane.f32.xlu0 %v1346_v29  ;;  %v3772_v3 = vpop.f32.mrf.mxu3  ;;  %v764_v29 = vadd.f32 %v3599_v5, %v3633_v48 }
 0x1c5   :  { %2982 = vmatmul.msk.f32.gmra.mxu2 %vm213_vm0, %v355_v58  ;;  %v3774_v38 = vpop.f32.mrf.mxu1 }
 0x1c6   :  { %1099 = vmatpush.msrb.mxu2 %v746_v62  ;;  %v767_v62 = vadd.f32 %v3599_v5, %v3643_v2 }
 0x1c8   :  { %1100 = vmatpush.msrb.mxu2 %v743_v54  ;;  %v875_v50 = vpop.f32.mrf.mxu2  ;;  %v367_v54 = vadd.f32 %v3610_v19, %v3557_v22  ;;  %v358_v22 = vadd.f32 %v3610_v19, %v3535_v6  ;;  %v791_v6 = vadd.f32 %v3599_v5, %v3702_v37  ;;  %v758_v37 = vadd.f32 %v3599_v5, %v3624_v36 }
 0x1c9   :  { %v3766_v1 = vmul.f32 %v3739_v12, %v875_v50  ;;  %v704_v50 = vadd.f32 %v3599_v5, %v703_v49  ;;  %v752_v36 = vadd.f32 %v3599_v5, %v3601_v10  ;;  %v388_v10 = vadd.f32 %v3610_v19, %v3695_v43 }
 0x1ca   :  { %1101 = vmatpush.msrb.mxu2 %v740_v55  ;;  %v776_v43 = vadd.f32 %v3599_v5, %v3661_v44  ;;  %v806_v44 = vadd.f32 %v3599_v5, %v3756_v32 }
 0x1cb   :  { %v706_v41 = vpop.f32.mrf.mxu0  ;;  %v1349_v47 = vsel %vm213_vm0, %v3766_v1, -inf }
 0x1cc   :  { %1102 = vmatpush.msrb.mxu2 %v737_v51  ;;  %1350 = vmax.xlane.f32.xlu1 %v1349_v47  ;;  %v707_v2 = vadd.f32 %v3599_v5, %v706_v41  ;;  %v3792_v48 = vpop.f32.mrf.mxu3  ;;  %v794_v51 = vadd.f32 %v3599_v5, %v3711_v59  ;;  %v734_v41 = vadd.f32 %v3599_v5, %v3559_v24 }
 0x1cd   :  { %2985 = vmatmul.msk.f32.vlgmr.msra.gmra.mxu2 %vm213_vm0, %v364_v60  ;;  %v3788_v55 = vpop.f32.mrf.mxu1  ;;  %v376_v47 = vadd.f32 %v3610_v19, %v3659_v39  ;;  %v728_v24 = vadd.f32 %v3599_v5, %v3544_v13  ;;  %v788_v39 = vadd.f32 %v3599_v5, %v3690_v25  ;;  %v361_v25 = vadd.f32 %v3610_v19, %v3542_v11 }
 0x1ce   :  { %1157 = vmatpush.msra.mxu2 %v770_v30  ;;  %v785_v30 = vadd.f32 %v3599_v5, %v3684_v17 }
 0x1d0   :  { %1158 = vmatpush.msra.mxu2 %v767_v62  ;;  %v379_v62 = vadd.f32 %v3610_v19, %v3668_v57  ;;  %v749_v57 = vadd.f32 %v3599_v5, %v3591_v0  ;;  %v782_v0 = vadd.f32 %v3599_v5, %v3678_v63  ;;  %v809_v63 = vadd.f32 %v3599_v5, %v3774_v38 }
 0x1d1   :  { %v400_v38 = vadd.f32 %v3610_v19, %v3688_v21 }
 0x1d2   :  { %1159 = vmatpush.msra.mxu2 %v764_v29  ;;  %v755_v29 = vadd.f32 %v3599_v5, %v3617_v27 }
 0x1d3   :  { %v709_v58 = vpop.f32.mrf.mxu0 }
 0x1d4   :  { %v710_v40 = vadd.f32 %v3599_v5, %v709_v58  ;;  %1160 = vmatpush.msra.mxu2 %v761_v16  ;;  %v370_v58 = vadd.f32 %v3610_v19, %v3565_v28  ;;  %v812_v28 = vadd.f32 %v3599_v5, %v3788_v55  ;;  %v391_v55 = vadd.f32 %v3610_v19, %v3705_v45 }
 0x1d5   :  { %2986 = vmatmul.msk.f32.gmra.mxu2 %vm213_vm0, %v367_v54  ;;  %v814_v60 = vpop.f32.mrf.mxu1  ;;  %v803_v45 = vadd.f32 %v3599_v5, %v3734_v61  ;;  %v403_v61 = vadd.f32 %v3610_v19, %v3698_v33  ;;  %v412_v33 = vadd.f32 %v3610_v19, %v3727_v26  ;;  %v415_v26 = vadd.f32 %v3610_v19, %v3748_v56 }
 0x1d6   :  { %1012 = vmatpush.msrb.mxu3 %v710_v40  ;;  %v815_v40 = vadd.f32 %v3599_v5, %v814_v60 }
 0x1d8   :  { %1013 = vmatpush.msrb.mxu3 %v707_v2  ;;  %v779_v2 = vadd.f32 %v3599_v5, %v3672_v4  ;;  %v373_v4 = vadd.f32 %v3610_v19, %v3573_v35 }
 0x1da   :  { %1014 = vmatpush.msrb.mxu3 %v704_v50  ;;  %v773_v50 = vadd.f32 %v3599_v5, %v3656_v31  ;;  %v382_v31 = vadd.f32 %v3610_v19, %v3680_v14  ;;  %v797_v14 = vadd.f32 %v3599_v5, %v3716_v7 }
 0x1dc   :  { %1015 = vmatpush.msrb.mxu3 %v701_v42 }
 0x1dd   :  { %2983 = vmatmul.msk.f32.vlgmr.msrb.gmra.mxu3 %vm213_vm0, %v358_v22  ;;  %2989 = vmatmul.msk.f32.vlgmr.msrb.gmra.mxu2 %vm213_vm0, %v376_v47  ;;  %v817_v8 = vpop.f32.mrf.mxu1 }
 0x1de   :  { %1070 = vmatpush.msra.mxu3 %v734_v41  ;;  %1215 = vmatpush.msrb.mxu2 %v794_v51  ;;  %v818_v16 = vadd.f32 %v3599_v5, %v817_v8  ;;  %v800_v51 = vadd.f32 %v3599_v5, %v3721_v15  ;;  %v385_v41 = vadd.f32 %v3610_v19, %v3686_v20 }
 0x1df   :  { %v394_v20 = vadd.f32 %v3610_v19, %v3714_v52  ;;  %v397_v52 = vadd.f32 %v3610_v19, %v3724_v23  ;;  %v1634_v23 = vld [vmem:[#allocation8] sm:$0xff]  ;;  %v421_v8 = vadd.f32 %v3610_v19, %v3792_v48 }
 0x1e0   :  { %1071 = vmatpush.msra.mxu3 %v731_v34  ;;  %v901_v59 = vpop.f32.mrf.mxu3  ;;  %1216 = vmatpush.msrb.mxu2 %v791_v6 }
 0x1e1   :  { %v3815_v49 = vmul.f32 %v3739_v12, %v901_v59 }
 0x1e2   :  { %1072 = vmatpush.msra.mxu3 %v728_v24  ;;  %1217 = vmatpush.msrb.mxu2 %v788_v39  ;;  %v406_v39 = vadd.f32 %v3610_v19, %v3709_v53 }
 0x1e3   :  { %v1352_v13 = vsel %vm213_vm0, %v3815_v49, -inf }
 0x1e4   :  { %1073 = vmatpush.msra.mxu3 %v725_v18  ;;  %1353 = vmax.xlane.f32.xlu0 %v1352_v13  ;;  %v1635_v18 = vld [vmem:[#allocation8 + $0x8] sm:$0xff] }
 0x1e5   :  { %1218 = vmatpush.msrb.mxu2 %v785_v30  ;;  %2984 = vmatmul.msk.f32.gmra.mxu3 %vm213_vm0, %v361_v25  ;;  %v820_v54 = vpop.f32.mrf.mxu1  ;;  %v409_v30 = vadd.f32 %v3610_v19, %v3718_v9 }
 0x1e6   :  { %1128 = vmatpush.msrb.mxu3 %v758_v37  ;;  %2990 = vmatmul.msk.f32.gmra.mxu2 %vm213_vm0, %v379_v62  ;;  %v821_v59 = vadd.f32 %v3599_v5, %v820_v54  ;;  %v418_v62 = vadd.f32 %v3610_v19, %v3772_v3 }
 0x1e8   :  { %1129 = vmatpush.msrb.mxu3 %v755_v29  ;;  %v904_v11 = vpop.f32.mrf.mxu3 }
 0x1e9   :  { %v3838_v17 = vmul.f32 %v3739_v12, %v904_v11  ;;  %v1637_v11 = vld [vmem:[#allocation8 + $0x18] sm:$0xff] }
 0x1ea   :  { %1130 = vmatpush.msrb.mxu3 %v752_v36 }
 0x1eb   :  { %v1355_v27 = vsel %vm213_vm0, %v3838_v17, -inf }
 0x1ec   :  { %1131 = vmatpush.msrb.mxu3 %v749_v57  ;;  %1356 = vmax.xlane.f32.xlu1 %v1355_v27 }
 0x1ed   :  { %2987 = vmatmul.msk.f32.vlgmr.msra.gmra.mxu3 %vm213_vm0, %v370_v58  ;;  %v823_v42 = vpop.f32.mrf.mxu1  ;;  %v1636_v58 = vld [vmem:[#allocation8 + $0x10] sm:$0xff] }
 0x1ee   :  { %2993 = vmatmul.msk.f32.vlgmr.msra.gmra.mxu2 %vm213_vm0, %v388_v10  ;;  %1186 = vmatpush.msra.mxu3 %v782_v0  ;;  %v824_v24 = vadd.f32 %v3599_v5, %v823_v42 }
 0x1ef   :  { %1273 = vmatpush.msra.mxu2 %v818_v16 }
 0x1f0   :  { %1187 = vmatpush.msra.mxu3 %v779_v2 }
 0x1f1   :  { %1274 = vmatpush.msra.mxu2 %v815_v40 }
 0x1f2   :  { %1188 = vmatpush.msra.mxu3 %v776_v43 }
 0x1f3   :  { %1275 = vmatpush.msra.mxu2 %v812_v28 }
 0x1f4   :  { %1189 = vmatpush.msra.mxu3 %v773_v50 }
 0x1f5   :  { %1276 = vmatpush.msra.mxu2 %v809_v63  ;;  %2988 = vmatmul.msk.f32.gmra.mxu3 %vm213_vm0, %v373_v4  ;;  %v826_v35 = vpop.f32.mrf.mxu1 }
 0x1f6   :  { %2994 = vmatmul.msk.f32.gmra.mxu2 %vm213_vm0, %v391_v55  ;;  %v827_v6 = vadd.f32 %v3599_v5, %v826_v35 }
 0x1fd   :  { %2991 = vmatmul.msk.f32.vlgmr.msrb.gmra.mxu3 %vm213_vm0, %v382_v31  ;;  %v829_v47 = vpop.f32.mrf.mxu1 }
 0x1fe   :  { %2997 = vmatmul.msk.f32.vlgmr.msrb.gmra.mxu2 %vm213_vm0, %v400_v38  ;;  %1244 = vmatpush.msrb.mxu3 %v806_v44  ;;  %v830_v34 = vadd.f32 %v3599_v5, %v829_v47  ;;  %v1639_v38 = vld [vmem:[#allocation8 + $0x28] sm:$0xff] }
 0x1ff   :  { %3005 = vmatpush.xpose.msk.msrb.mxu2 %vm213_vm0, %v1635_v18 }
 0x200   :  { %v930_v22 = vpop.f32.mrf.mxu2  ;;  %1245 = vmatpush.msrb.mxu3 %v803_v45 }
 0x201   :  { %v3881_v32 = vmul.f32 %v3739_v12, %v930_v22 }
 0x202   :  { %1246 = vmatpush.msrb.mxu3 %v800_v51 }
 0x203   :  { %v1358_v21 = vsel %vm213_vm0, %v3881_v32, -inf  ;;  %3006 = vmatpush.xpose.msk.msrb.mxu2 %vm213_vm0, %v1634_v23 }
 0x204   :  { %1359 = vmax.xlane.f32.xlu2 %v1358_v21  ;;  %1247 = vmatpush.msrb.mxu3 %v797_v14  ;;  %v1638_v14 = vld [vmem:[#allocation8 + $0x20] sm:$0xff] }
 0x205   :  { %2992 = vmatmul.msk.f32.gmra.mxu3 %vm213_vm0, %v385_v41 }
 0x206   :  { %2998 = vmatmul.msk.f32.gmra.mxu2 %vm213_vm0, %v403_v61 }
 0x208   :  { %v933_v15 = vpop.f32.mrf.mxu2 }
 0x209   :  { %v3894_v7 = vmul.f32 %v3739_v12, %v933_v15 }
 0x20b   :  { %v1361_v60 = vsel %vm213_vm0, %v3894_v7, -inf }
 0x20c   :  { %1362 = vmax.xlane.f32.xlu0 %v1361_v60 }
 0x20d   :  { %2995 = vmatmul.msk.f32.vlgmr.msra.gmra.mxu3 %vm213_vm0, %v394_v20 }
 0x20e   :  { %3001 = vmatmul.msk.f32.vlgmr.msra.gmra.mxu2 %vm213_vm0, %v412_v33  ;;  %1302 = vmatpush.msra.mxu3 %v830_v34 }
 0x20f   :  { %3013 = vmatpush.xpose.msk.msra.mxu2 %vm213_vm0, %v1639_v38 }
 0x210   :  { %1303 = vmatpush.msra.mxu3 %v827_v6 }
 0x212   :  { %1304 = vmatpush.msra.mxu3 %v824_v24 }
 0x213   :  { %3014 = vmatpush.xpose.msk.msra.mxu2 %vm213_vm0, %v1638_v14 }
 0x214   :  { %1305 = vmatpush.msra.mxu3 %v821_v59 }
 0x215   :  { %2996 = vmatmul.msk.f32.gmra.mxu3 %vm213_vm0, %v397_v52 }
 0x216   :  { %3002 = vmatmul.msk.f32.gmra.mxu2 %vm213_vm0, %v415_v26 }
 0x21d   :  { %2999 = vmatmul.msk.f32.vlgmr.msrb.gmra.mxu3 %vm213_vm0, %v406_v39 }
 0x21e   :  { %3009 = vmatpush.xpose.msk.msrb.mxu3 %vm213_vm0, %v1637_v11 }
 0x220   :  { %v959_v5 = vpop.f32.mrf.mxu3 }
 0x221   :  { %v3919_v37 = vmul.f32 %v3739_v12, %v959_v5 }
 0x222   :  { %3010 = vmatpush.xpose.msk.msrb.mxu3 %vm213_vm0, %v1636_v58 }
 0x223   :  { %v1364_v56 = vsel %vm213_vm0, %v3919_v37, -inf }
 0x224   :  { %1365 = vmax.xlane.f32.xlu2 %v1364_v56 }
 0x225   :  { %3000 = vmatmul.msk.f32.gmra.mxu3 %vm213_vm0, %v409_v30 }
 0x228   :  { %v962_v53 = vpop.f32.mrf.mxu3 }
 0x229   :  { %v3928_v13 = vmul.f32 %v3739_v12, %v962_v53 }
 0x22b   :  { %v1367_v25 = vsel %vm213_vm0, %v3928_v13, -inf }
 0x22c   :  { %1368 = vmax.xlane.f32.xlu1 %v1367_v25 }
 0x22d   :  { %3003 = vmatmul.msk.f32.vlgmr.msra.gmra.mxu3 %vm213_vm0, %v418_v62 }
 0x235   :  { %3004 = vmatmul.msk.f32.gmra.mxu3 %vm213_vm0, %v421_v8 }
 0x237   :  { %v1348_v9 = vpop.xlane.xlu0 %1347 }
 0x238   :  { %v1442_v29 = vsub.f32 %v3744_v46, %v1348_v9 }
 0x23a   :  { %v1474_v36 = vmul.f32 1.442695, %v1442_v29 }
 0x23c   :  { %3103 = vpow2.f32 %v1474_v36 }
 0x23f   :  { %v1351_v57 = vpop.xlane.xlu1 %1350 }
 0x240   :  { %v1443_v27 = vsub.f32 %v3766_v1, %v1351_v57  ;;  %v988_v3 = vpop.f32.mrf.mxu2 }
 0x241   :  { %v3942_v16 = vmul.f32 %v3739_v12, %v988_v3 }
 0x242   :  { %v3104_v10 = vpop.eup %3103  ;;  %v1476_v19 = vmul.f32 1.442695, %v1443_v27 }
 0x243   :  { %3007 = vmatmul.msk.f32.vlgmr.msrb.gmra.mxu2 %vm213_vm0, %v3104_v10  ;;  %v1370_v46 = vsel %vm213_vm0, %v3942_v16, -inf  ;;  %v1538_v40 = vsel %vm213_vm0, %v3104_v10, 0.0  ;;  %v1640_v10 = vld [vmem:[#allocation8 + $0x30] sm:$0xff] }
 0x244   :  { %3105 = vpow2.f32 %v1476_v19  ;;  %1371 = vmax.xlane.f32.xlu2 %v1370_v46 }
 0x248   :  { %v991_v48 = vpop.f32.mrf.mxu2 }
 0x249   :  { %v3949_v1 = vmul.f32 %v3739_v12, %v991_v48 }
 0x24a   :  { %v3106_v54 = vpop.eup %3105 }
 0x24b   :  { %3008 = vmatmul.msk.f32.gmra.mxu2 %vm213_vm0, %v3106_v54  ;;  %v1541_v0 = vsel %vm213_vm0, %v3106_v54, 0.0  ;;  %v1373_v2 = vsel %vm213_vm0, %v3949_v1, -inf }
 0x24c   :  { %1542 = vadd.xlane.f32.xlu0 %v1541_v0  ;;  %1539 = vadd.xlane.f32.xlu2 %v1538_v40 }
 0x24d   :  { %1374 = vmax.xlane.f32.xlu1 %v1373_v2 }
 0x250   :  { %v1046_v28 = vpop.f32.mrf.mxu2 }
 0x251   :  { %v3957_v43 = vmul.f32 %v3739_v12, %v1046_v28 }
 0x253   :  { %v1382_v63 = vsel %vm213_vm0, %v3957_v43, -inf }
 0x254   :  { %1383 = vmax.xlane.f32.xlu0 %v1382_v63 }
 0x257   :  { %v1354_v50 = vpop.xlane.xlu0 %1353 }
 0x258   :  { %v1444_v4 = vsub.f32 %v3815_v49, %v1354_v50  ;;  %v1049_v55 = vpop.f32.mrf.mxu2 }
 0x259   :  { %v3963_v44 = vmul.f32 %v3739_v12, %v1049_v55 }
 0x25a   :  { %v1478_v42 = vmul.f32 1.442695, %v1444_v4 }
 0x25b   :  { %v1385_v31 = vsel %vm213_vm0, %v3963_v44, -inf }
 0x25c   :  { %3107 = vpow2.f32 %v1478_v42  ;;  %1386 = vmax.xlane.f32.xlu2 %v1385_v31 }
 0x25f   :  { %v1357_v35 = vpop.xlane.xlu1 %1356 }
 0x260   :  { %v1445_v45 = vsub.f32 %v3838_v17, %v1357_v35  ;;  %v1017_v22 = vpop.f32.mrf.mxu3  ;;  %v1104_v49 = vpop.f32.mrf.mxu2 }
 0x261   :  { %v3970_v51 = vmul.f32 %v3739_v12, %v1017_v22  ;;  %v3973_v61 = vmul.f32 %v3739_v12, %v1104_v49 }
 0x262   :  { %v3108_v21 = vpop.eup %3107  ;;  %v1480_v41 = vmul.f32 1.442695, %v1445_v45 }
 0x263   :  { %3011 = vmatmul.msk.f32.vlgmr.msrb.gmra.mxu3 %vm213_vm0, %v3108_v21  ;;  %v1376_v15 = vsel %vm213_vm0, %v3970_v51, -inf  ;;  %v1394_v17 = vsel %vm213_vm0, %v3973_v61, -inf  ;;  %v1544_v24 = vsel %vm213_vm0, %v3108_v21, 0.0 }
 0x264   :  { %3109 = vpow2.f32 %v1480_v41  ;;  %1377 = vmax.xlane.f32.xlu0 %v1376_v15  ;;  %1395 = vmax.xlane.f32.xlu1 %v1394_v17 }
 0x268   :  { %v1020_v47 = vpop.f32.mrf.mxu3 }
 0x269   :  { %v1107_v60 = vpop.f32.mrf.mxu2  ;;  %v3982_v20 = vmul.f32 %v3739_v12, %v1020_v47 }
 0x26a   :  { %v3110_v34 = vpop.eup %3109  ;;  %v3985_v33 = vmul.f32 %v3739_v12, %v1107_v60 }
 0x26b   :  { %3012 = vmatmul.msk.f32.gmra.mxu3 %vm213_vm0, %v3110_v34  ;;  %v1379_v6 = vsel %vm213_vm0, %v3982_v20, -inf  ;;  %v1547_v18 = vsel %vm213_vm0, %v3110_v34, 0.0 }
 0x26c   :  { %v1397_v59 = vsel %vm213_vm0, %v3985_v33, -inf  ;;  %1380 = vmax.xlane.f32.xlu2 %v1379_v6  ;;  %1545 = vadd.xlane.f32.xlu1 %v1544_v24 }
 0x26d   :  { %1398 = vmax.xlane.f32.xlu0 %v1397_v59 }
 0x270   :  { %v1075_v52 = vpop.f32.mrf.mxu3 }
 0x271   :  { %v1162_v26 = vpop.f32.mrf.mxu2  ;;  %v3994_v39 = vmul.f32 %v3739_v12, %v1075_v52 }
 0x272   :  { %v4000_v56 = vmul.f32 %v3739_v12, %v1162_v26 }
 0x273   :  { %v1388_v5 = vsel %vm213_vm0, %v3994_v39, -inf }
 0x274   :  { %1548 = vadd.xlane.f32.xlu2 %v1547_v18  ;;  %1389 = vmax.xlane.f32.xlu1 %v1388_v5  ;;  %v1406_v36 = vsel %vm213_vm0, %v4000_v56, -inf  ;;  %v1642_v18 = vld [vmem:[#allocation8 + $0x40] sm:$0xff] }
 0x277   :  { %v1360_v23 = vpop.xlane.xlu2 %1359 }
 0x278   :  { %v1446_v30 = vsub.f32 %v3881_v32, %v1360_v23  ;;  %v1078_v53 = vpop.f32.mrf.mxu3  ;;  %v1641_v32 = vld [vmem:[#allocation8 + $0x38] sm:$0xff] }
 0x279   :  { %v1165_v25 = vpop.f32.mrf.mxu2  ;;  %v4004_v8 = vmul.f32 %v3739_v12, %v1078_v53  ;;  %3017 = vmatpush.xpose.msk.msra.mxu3 %vm213_vm0, %v1641_v32 }
 0x27a   :  { %v1482_v62 = vmul.f32 1.442695, %v1446_v30  ;;  %v4007_v9 = vmul.f32 %v3739_v12, %v1165_v25 }
 0x27b   :  { %v1391_v29 = vsel %vm213_vm0, %v4004_v8, -inf }
 0x27c   :  { %3111 = vpow2.f32 %v1482_v62  ;;  %v1409_v11 = vsel %vm213_vm0, %v4007_v9, -inf  ;;  %1392 = vmax.xlane.f32.xlu0 %v1391_v29  ;;  %1407 = vmax.xlane.f32.xlu2 %v1406_v36 }
 0x27d   :  { %1410 = vmax.xlane.f32.xlu1 %v1409_v11  ;;  %3018 = vmatpush.xpose.msk.msra.mxu3 %vm213_vm0, %v1640_v10  ;;  %v1647_v11 = vld [vmem:[#allocation8 + $0x68] sm:$0xff] }
 0x27f   :  { %v1363_v57 = vpop.xlane.xlu0 %1362 }
 0x280   :  { %v1447_v27 = vsub.f32 %v3894_v7, %v1363_v57  ;;  %v1133_v3 = vpop.f32.mrf.mxu3  ;;  %v1646_v57 = vld [vmem:[#allocation8 + $0x60] sm:$0xff] }
 0x281   :  { %v1220_v58 = vpop.f32.mrf.mxu2  ;;  %v4018_v48 = vmul.f32 %v3739_v12, %v1133_v3 }
 0x282   :  { %v3112_v19 = vpop.eup %3111  ;;  %v1484_v46 = vmul.f32 1.442695, %v1447_v27  ;;  %v4021_v54 = vmul.f32 %v3739_v12, %v1220_v58 }
 0x283   :  { %3015 = vmatmul.msk.f32.vlgmr.msra.gmra.mxu2 %vm213_vm0, %v3112_v19  ;;  %v1400_v0 = vsel %vm213_vm0, %v4018_v48, -inf  ;;  %v1550_v55 = vsel %vm213_vm0, %v3112_v19, 0.0 }
 0x284   :  { %3113 = vpow2.f32 %v1484_v46  ;;  %v1418_v7 = vsel %vm213_vm0, %v4021_v54, -inf  ;;  %1401 = vmax.xlane.f32.xlu2 %v1400_v0 }
 0x285   :  { %1419 = vmax.xlane.f32.xlu0 %v1418_v7 }
 0x288   :  { %v1136_v40 = vpop.f32.mrf.mxu3 }
 0x289   :  { %v1223_v2 = vpop.f32.mrf.mxu2  ;;  %v4030_v63 = vmul.f32 %v3739_v12, %v1136_v40 }
 0x28a   :  { %v3114_v28 = vpop.eup %3113  ;;  %v4033_v50 = vmul.f32 %v3739_v12, %v1223_v2  ;;  %v1645_v2 = vld [vmem:[#allocation8 + $0x58] sm:$0xff] }
 0x28b   :  { %3016 = vmatmul.msk.f32.gmra.mxu2 %vm213_vm0, %v3114_v28  ;;  %v1403_v4 = vsel %vm213_vm0, %v4030_v63, -inf  ;;  %v1553_v45 = vsel %vm213_vm0, %v3114_v28, 0.0  ;;  %3025 = vmatpush.xpose.msk.msrb.mxu3 %vm213_vm0, %v1645_v2  ;;  %v1648_v2 = vld [vmem:[#allocation8 + $0x70] sm:$0xff] }
 0x28c   :  { %v1421_v42 = vsel %vm213_vm0, %v4033_v50, -inf  ;;  %1404 = vmax.xlane.f32.xlu1 %v1403_v4 }
 0x28d   :  { %1551 = vadd.xlane.f32.xlu0 %v1550_v55  ;;  %1422 = vmax.xlane.f32.xlu2 %v1421_v42  ;;  %v1651_v42 = vld [vmem:[#allocation8 + $0x88] sm:$0xff] }
 0x290   :  { %v1191_v31 = vpop.f32.mrf.mxu3 }
 0x291   :  { %v1278_v38 = vpop.f32.mrf.mxu2  ;;  %v4042_v35 = vmul.f32 %v3739_v12, %v1191_v31  ;;  %v1644_v31 = vld [vmem:[#allocation8 + $0x50] sm:$0xff] }
 0x292   :  { %v4048_v14 = vmul.f32 %v3739_v12, %v1278_v38  ;;  %3026 = vmatpush.xpose.msk.msrb.mxu3 %vm213_vm0, %v1644_v31 }
 0x293   :  { %v1412_v22 = vsel %vm213_vm0, %v4042_v35, -inf }
 0x294   :  { %1554 = vadd.xlane.f32.xlu1 %v1553_v45  ;;  %v1430_v6 = vsel %vm213_vm0, %v4048_v14, -inf }
 0x295   :  { %1413 = vmax.xlane.f32.xlu0 %v1412_v22  ;;  %v1650_v22 = vld [vmem:[#allocation8 + $0x80] sm:$0xff] }
 0x297   :  { %v1366_v49 = vpop.xlane.xlu2 %1365 }
 0x298   :  { %v1448_v21 = vsub.f32 %v3919_v37, %v1366_v49  ;;  %v1194_v41 = vpop.f32.mrf.mxu3  ;;  %v1643_v37 = vld [vmem:[#allocation8 + $0x48] sm:$0xff] }
 0x299   :  { %v1281_v15 = vpop.f32.mrf.mxu2  ;;  %v4052_v47 = vmul.f32 %v3739_v12, %v1194_v41  ;;  %3021 = vmatpush.xpose.msk.msrb.mxu2 %vm213_vm0, %v1643_v37 }
 0x29a   :  { %v1486_v17 = vmul.f32 1.442695, %v1448_v21  ;;  %v4055_v60 = vmul.f32 %v3739_v12, %v1281_v15 }
 0x29b   :  { %v1415_v34 = vsel %vm213_vm0, %v4052_v47, -inf }
 0x29c   :  { %3115 = vpow2.f32 %v1486_v17  ;;  %v1433_v24 = vsel %vm213_vm0, %v4055_v60, -inf  ;;  %1416 = vmax.xlane.f32.xlu2 %v1415_v34  ;;  %1431 = vmax.xlane.f32.xlu1 %v1430_v6 }
 0x29d   :  { %1434 = vmax.xlane.f32.xlu0 %v1433_v24  ;;  %3022 = vmatpush.xpose.msk.msrb.mxu2 %vm213_vm0, %v1642_v18 }
 0x29f   :  { %v1369_v59 = vpop.xlane.xlu1 %1368 }
 0x2a0   :  { %v1449_v52 = vsub.f32 %v3928_v13, %v1369_v59  ;;  %v1249_v26 = vpop.f32.mrf.mxu3 }
 0x2a1   :  { %v4066_v30 = vmul.f32 %v3739_v12, %v1249_v26  ;;  %3029 = vmatpush.xpose.msk.msra.mxu2 %vm213_vm0, %v1647_v11 }
 0x2a2   :  { %v3116_v5 = vpop.eup %3115  ;;  %v1488_v23 = vmul.f32 1.442695, %v1449_v52 }
 0x2a3   :  { %3019 = vmatmul.msk.f32.vlgmr.msra.gmra.mxu3 %vm213_vm0, %v3116_v5  ;;  %v1556_v53 = vsel %vm213_vm0, %v3116_v5, 0.0  ;;  %v1424_v25 = vsel %vm213_vm0, %v4066_v30, -inf }
 0x2a4   :  { %3117 = vpow2.f32 %v1488_v23  ;;  %1557 = vadd.xlane.f32.xlu2 %v1556_v53  ;;  %1425 = vmax.xlane.f32.xlu1 %v1424_v25 }
 0x2a5   :  { %3030 = vmatpush.xpose.msk.msra.mxu2 %vm213_vm0, %v1646_v57 }
 0x2a8   :  { %v1252_v13 = vpop.f32.mrf.mxu3 }
 0x2a9   :  { %v4074_v29 = vmul.f32 %v3739_v12, %v1252_v13 }
 0x2aa   :  { %v3118_v62 = vpop.eup %3117 }
 0x2ab   :  { %3020 = vmatmul.msk.f32.gmra.mxu3 %vm213_vm0, %v3118_v62  ;;  %v1427_v36 = vsel %vm213_vm0, %v4074_v29, -inf  ;;  %v1559_v58 = vsel %vm213_vm0, %v3118_v62, 0.0 }
 0x2ac   :  { %1428 = vmax.xlane.f32.xlu0 %v1427_v36 }
 0x2b0   :  { %v1307_v32 = vpop.f32.mrf.mxu3 }
 0x2b1   :  { %v4081_v27 = vmul.f32 %v3739_v12, %v1307_v32 }
 0x2b3   :  { %v1436_v3 = vsel %vm213_vm0, %v4081_v27, -inf }
 0x2b4   :  { %1437 = vmax.xlane.f32.xlu2 %v1436_v3  ;;  %1560 = vadd.xlane.f32.xlu0 %v1559_v58 }
 0x2b7   :  { %v1372_v10 = vpop.xlane.xlu2 %1371 }
 0x2b8   :  { %v1450_v19 = vsub.f32 %v3942_v16, %v1372_v10  ;;  %v1310_v46 = vpop.f32.mrf.mxu3 }
 0x2b9   :  { %v4089_v7 = vmul.f32 %v3739_v12, %v1310_v46 }
 0x2ba   :  { %v1490_v0 = vmul.f32 1.442695, %v1450_v19 }
 0x2bb   :  { %v1439_v40 = vsel %vm213_vm0, %v4089_v7, -inf }
 0x2bc   :  { %3119 = vpow2.f32 %v1490_v0  ;;  %1440 = vmax.xlane.f32.xlu1 %v1439_v40 }
 0x2bf   :  { %v1543_v28 = vpop.xlane.xlu0 %1542  ;;  %v1540_v4 = vpop.xlane.xlu2 %1539 }
 0x2c0   :  { %3121 = vrcp.f32 %v1543_v28  ;;  %v1375_v55 = vpop.xlane.xlu1 %1374  ;;  %v2237_v37 = vand.u32 2147483648, %v1540_v4  ;;  %v2252_v59 = vand.u32 2147483648, %v1543_v28  ;;  %v2250_v5 = vand.u32 2147483647, %v1543_v28 }
 0x2c1   :  { %3123 = vrcp.f32 %v1540_v4  ;;  %v1451_v16 = vsub.f32 %v3949_v1, %v1375_v55  ;;  %v2235_v53 = vand.u32 2147483647, %v1540_v4  ;;  %vm2246_vm7 = vweird.f32 %v1543_v28 }
 0x2c2   :  { %v3120_v38 = vpop.eup %3119  ;;  %vm2231_vm8 = vweird.f32 %v1540_v4  ;;  %v2253_v36 = vor.u32 1.1754944e-38, %v2252_v59  ;;  %v2238_v11 = vor.u32 1.1754944e-38, %v2237_v37  ;;  %vm2251_vm11 = vcmp.eq.f32.partialorder %v2250_v5, 8.507059e+37 }
 0x2c3   :  { %v1492_v12 = vmul.f32 1.442695, %v1451_v16  ;;  %3023 = vmatmul.msk.f32.vlgmr.msrb.gmra.mxu2 %vm213_vm0, %v3120_v38  ;;  %v1562_v45 = vsel %vm213_vm0, %v3120_v38, 0.0  ;;  %vm2236_vm12 = vcmp.eq.f32.partialorder %v2235_v53, 8.507059e+37  ;;  %v1655_v16 = vld [vmem:[#allocation8 + $0xa8] sm:$0xff] }
 0x2c4   :  { %3037 = vmatpush.xpose.msk.msrb.mxu2 %vm213_vm0, %v1651_v42  ;;  %1563 = vadd.xlane.f32.xlu1 %v1562_v45  ;;  %v1654_v45 = vld [vmem:[#allocation8 + $0xa0] sm:$0xff] }
 0x2c5   :  { %3125 = vpow2.f32 %v1492_v12 }
 0x2c6   :  { %v3122_v49 = vpop.eup %3121  ;;  %v1695_v21 = vpop.f32.mrf.mxu2 }
 0x2c7   :  { %v3124_v41 = vpop.eup %3123  ;;  %v2242_v15 = vmul.f32 %v3122_v49, %v1543_v28  ;;  %v1384_v17 = vpop.xlane.xlu0 %1383  ;;  %vm2247_vm5 = vweird.f32 %v3122_v49 }
 0x2c8   :  { %v2227_v1 = vmul.f32 %v3124_v41, %v1540_v4  ;;  %3038 = vmatpush.xpose.msk.msrb.mxu2 %vm213_vm0, %v1650_v22  ;;  %v1454_v6 = vsub.f32 %v3957_v43, %v1384_v17  ;;  %vm2232_vm6 = vweird.f32 %v3124_v41  ;;  %v1649_v43 = vld [vmem:[#allocation8 + $0x78] sm:$0xff]  ;;  %vm2248_vm9 = vmor %vm2246_vm7, %vm2247_vm5 }
 0x2c9   :  { %v2243_v34 = vsub.f32 1.0, %v2242_v15  ;;  %3033 = vmatpush.xpose.msk.msra.mxu3 %vm213_vm0, %v1649_v43  ;;  %vm2233_vm10 = vmor %vm2231_vm8, %vm2232_vm6 }
 0x2ca   :  { %v2228_v24 = vsub.f32 1.0, %v2227_v1  ;;  %v1498_v26 = vmul.f32 1.442695, %v1454_v6 }
 0x2cb   :  { %v3126_v52 = vpop.eup %3125  ;;  %v2244_v18 = vmul.f32 %v3122_v49, %v2243_v34 }
 0x2cc   :  { %v2229_v23 = vmul.f32 %v3124_v41, %v2228_v24  ;;  %3024 = vmatmul.msk.f32.gmra.mxu2 %vm213_vm0, %v3126_v52  ;;  %v1565_v25 = vsel %vm213_vm0, %v3126_v52, 0.0  ;;  %3127 = vpow2.f32 %v1498_v26  ;;  %v1659_v52 = vld [vmem:[#allocation8 + $0xc8] sm:$0xff] }
 0x2cd   :  { %1566 = vadd.xlane.f32.xlu2 %v1565_v25  ;;  %v2245_v13 = vadd.f32 %v3122_v49, %v2244_v18  ;;  %3034 = vmatpush.xpose.msk.msra.mxu3 %vm213_vm0, %v1648_v2  ;;  %v1658_v25 = vld [vmem:[#allocation8 + $0xc0] sm:$0xff] }
 0x2ce   :  { %v2230_v62 = vadd.f32 %v3124_v41, %v2229_v23  ;;  %v1698_v3 = vpop.f32.mrf.mxu2 }
 0x2cf   :  { %v2249_v32 = vsel %vm2248_vm9, %v3122_v49, %v2245_v13  ;;  %v1387_v10 = vpop.xlane.xlu2 %1386 }
 0x2d0   :  { %v2234_v57 = vsel %vm2233_vm10, %v3124_v41, %v2230_v62  ;;  %v2254_v58 = vsel %vm2251_vm11, %v2253_v36, %v2249_v32  ;;  %v1455_v0 = vsub.f32 %v3963_v44, %v1387_v10 }
 0x2d1   :  { %v2239_v19 = vsel %vm2236_vm12, %v2238_v11, %v2234_v57  ;;  %v4104_v46 = vmul.f32 %v2254_v58, %v1698_v3 }
 0x2d2   :  { %v4107_v40 = vmul.f32 %v2239_v19, %v1695_v21  ;;  %v3128_v28 = vpop.eup %3127  ;;  %v1500_v4 = vmul.f32 1.442695, %v1455_v0 }
 0x2d3   :  { %v1574_v55 = vsel %vm213_vm0, %v3128_v28, 0.0 }
 0x2d4   :  { %3031 = vmatmul.msk.f32.vlgmr.msra.gmra.mxu2 %vm213_vm0, %v3128_v28  ;;  %3129 = vpow2.f32 %v1500_v4 }
 0x2d5   :  { %1575 = vadd.xlane.f32.xlu2 %v1574_v55  ;;  %3045 = vmatpush.xpose.msk.msra.mxu2 %vm213_vm0, %v1655_v16 }
 0x2d7   :  { %v1378_v42 = vpop.xlane.xlu0 %1377  ;;  %v1396_v44 = vpop.xlane.xlu1 %1395 }
 0x2d8   :  { %v1452_v31 = vsub.f32 %v3970_v51, %v1378_v42  ;;  %v1458_v38 = vsub.f32 %v3973_v61, %v1396_v44  ;;  %v1653_v61 = vld [vmem:[#allocation8 + $0x98] sm:$0xff] }
 0x2d9   :  { %3046 = vmatpush.xpose.msk.msra.mxu2 %vm213_vm0, %v1654_v45  ;;  %v1657_v44 = vld [vmem:[#allocation8 + $0xb8] sm:$0xff] }
 0x2da   :  { %v1494_v12 = vmul.f32 1.442695, %v1452_v31  ;;  %v3130_v22 = vpop.eup %3129  ;;  %v1506_v49 = vmul.f32 1.442695, %v1458_v38 }
 0x2db   :  { %v1577_v21 = vsel %vm213_vm0, %v3130_v22, 0.0 }
 0x2dc   :  { %3131 = vpow2.f32 %v1494_v12  ;;  %3032 = vmatmul.msk.f32.gmra.mxu2 %vm213_vm0, %v3130_v22  ;;  %1578 = vadd.xlane.f32.xlu0 %v1577_v21 }
 0x2dd   :  { %3133 = vpow2.f32 %v1506_v49 }
 0x2df   :  { %v1381_v41 = vpop.xlane.xlu2 %1380  ;;  %v1546_v15 = vpop.xlane.xlu1 %1545 }
 0x2e0   :  { %v1453_v51 = vsub.f32 %v3982_v20, %v1381_v41  ;;  %3135 = vrcp.f32 %v1546_v15  ;;  %v1399_v1 = vpop.xlane.xlu0 %1398  ;;  %v1652_v20 = vld [vmem:[#allocation8 + $0x90] sm:$0xff]  ;;  %v2267_v43 = vand.u32 2147483648, %v1546_v15  ;;  %v2265_v32 = vand.u32 2147483647, %v1546_v15 }
 0x2e1   :  { %v1459_v34 = vsub.f32 %v3985_v33, %v1399_v1  ;;  %vm2261_vm14 = vweird.f32 %v1546_v15 }
 0x2e2   :  { %v3132_v17 = vpop.eup %3131  ;;  %v1496_v24 = vmul.f32 1.442695, %v1453_v51  ;;  %v2268_v10 = vor.u32 1.1754944e-38, %v2267_v43  ;;  %vm2266_vm1 = vcmp.eq.f32.partialorder %v2265_v32, 8.507059e+37 }
 0x2e3   :  { %v3134_v6 = vpop.eup %3133  ;;  %3027 = vmatmul.msk.f32.vlgmr.msrb.gmra.mxu3 %vm213_vm0, %v3132_v17  ;;  %v1568_v37 = vsel %vm213_vm0, %v3132_v17, 0.0  ;;  %v1508_v59 = vmul.f32 1.442695, %v1459_v34 }
 0x2e4   :  { %3039 = vmatmul.msk.f32.vlgmr.msrb.gmra.mxu2 %vm213_vm0, %v3134_v6  ;;  %3041 = vmatpush.xpose.msk.msrb.mxu3 %vm213_vm0, %v1653_v61  ;;  %3137 = vpow2.f32 %v1496_v24  ;;  %v1586_v57 = vsel %vm213_vm0, %v3134_v6, 0.0 }
 0x2e5   :  { %1569 = vadd.xlane.f32.xlu0 %v1568_v37  ;;  %3139 = vpow2.f32 %v1508_v59  ;;  %3053 = vmatpush.xpose.msk.msrb.mxu2 %vm213_vm0, %v1659_v52 }
 0x2e6   :  { %v3136_v26 = vpop.eup %3135  ;;  %v1730_v58 = vpop.f32.mrf.mxu3 }
 0x2e7   :  { %v2257_v33 = vmul.f32 %v3136_v26, %v1546_v15  ;;  %v1549_v18 = vpop.xlane.xlu2 %1548  ;;  %v1390_v5 = vpop.xlane.xlu1 %1389  ;;  %vm2262_vm13 = vweird.f32 %v3136_v26  ;;  %v1656_v15 = vld [vmem:[#allocation8 + $0xb0] sm:$0xff] }
 0x2e8   :  { %3042 = vmatpush.xpose.msk.msrb.mxu3 %vm213_vm0, %v1652_v20  ;;  %3141 = vrcp.f32 %v1549_v18  ;;  %v1456_v23 = vsub.f32 %v3994_v39, %v1390_v5  ;;  %vm2263_vm15 = vmor %vm2261_vm14, %vm2262_vm13  ;;  %v2282_v12 = vand.u32 2147483648, %v1549_v18  ;;  %v2280_v41 = vand.u32 2147483647, %v1549_v18 }
 0x2e9   :  { %v2258_v53 = vsub.f32 1.0, %v2257_v33  ;;  %3054 = vmatpush.xpose.msk.msrb.mxu2 %vm213_vm0, %v1658_v25  ;;  %vm2276_vm3 = vweird.f32 %v1549_v18  ;;  %v1662_v33 = vld [vmem:[#allocation8 + $0xe0] sm:$0xff]  ;;  %v1661_v25 = vld [vmem:[#allocation8 + $0xd8] sm:$0xff] }
 0x2ea   :  { %v4127_v13 = vpop.eup %3137  ;;  %v1502_v62 = vmul.f32 1.442695, %v1456_v23  ;;  %v2283_v51 = vor.u32 1.1754944e-38, %v2282_v12  ;;  %vm2281_vm5 = vcmp.eq.f32.partialorder %v2280_v41, 8.507059e+37 }
 0x2eb   :  { %v4130_v36 = vpop.eup %3139  ;;  %v2259_v11 = vmul.f32 %v3136_v26, %v2258_v53  ;;  %3028 = vmatmul.msk.f32.gmra.mxu3 %vm213_vm0, %v4127_v13 }
 0x2ec   :  { %3143 = vpow2.f32 %v1502_v62  ;;  %3040 = vmatmul.msk.f32.gmra.mxu2 %vm213_vm0, %v4130_v36 }
 0x2ed   :  { %1587 = vadd.xlane.f32.xlu0 %v1586_v57  ;;  %v2260_v39 = vadd.f32 %v3136_v26, %v2259_v11 }
 0x2ee   :  { %v3142_v3 = vpop.eup %3141  ;;  %v1733_v34 = vpop.f32.mrf.mxu3 }
 0x2ef   :  { %v2264_v19 = vsel %vm2263_vm15, %v3136_v26, %v2260_v39  ;;  %v2272_v0 = vmul.f32 %v3142_v3, %v1549_v18  ;;  %v1393_v2 = vpop.xlane.xlu0 %1392  ;;  %v1408_v28 = vpop.xlane.xlu2 %1407  ;;  %vm2277_vm2 = vweird.f32 %v3142_v3  ;;  %v1663_v26 = vld [vmem:[#allocation8 + $0xe8] sm:$0xff] }
 0x2f0   :  { %v2269_v4 = vsel %vm2266_vm1, %v2268_v10, %v2264_v19  ;;  %v1457_v55 = vsub.f32 %v4004_v8, %v1393_v2  ;;  %v1462_v16 = vsub.f32 %v4000_v56, %v1408_v28  ;;  %v1411_v49 = vpop.xlane.xlu1 %1410  ;;  %vm2278_vm4 = vmor %vm2276_vm3, %vm2277_vm2 }
 0x2f1   :  { %v2270_v42 = vmul.f32 %v2269_v4, %v1730_v58  ;;  %v2273_v31 = vsub.f32 1.0, %v2272_v0  ;;  %v1463_v8 = vsub.f32 %v4007_v9, %v1411_v49 }
 0x2f2   :  { %v4139_v38 = vpop.eup %3143  ;;  %v1504_v45 = vmul.f32 1.442695, %v1457_v55  ;;  %v1514_v22 = vmul.f32 1.442695, %v1462_v16 }
 0x2f3   :  { %v2274_v21 = vmul.f32 %v3142_v3, %v2273_v31  ;;  %3035 = vmatmul.msk.f32.vlgmr.msra.gmra.mxu3 %vm213_vm0, %v4139_v38  ;;  %2708 = vrot.lane.b32.xlu1 %v2270_v42, %s3390_s9  ;;  %v1516_v59 = vmul.f32 1.442695, %v1463_v8 }
 0x2f4   :  { %3145 = vpow2.f32 %v1504_v45  ;;  %3049 = vmatpush.xpose.msk.msra.mxu3 %vm213_vm0, %v1657_v44 }
 0x2f5   :  { %v2275_v56 = vadd.f32 %v3142_v3, %v2274_v21  ;;  %3147 = vpow2.f32 %v1514_v22 }
 0x2f7   :  { %v2279_v1 = vsel %vm2278_vm4, %v3142_v3, %v2275_v56  ;;  %v1402_v61 = vpop.xlane.xlu2 %1401  ;;  %v1665_v56 = vld [vmem:[#allocation8 + $0xf8] sm:$0xff] }
 0x2f8   :  { %v1420_v17 = vpop.xlane.xlu0 %1419  ;;  %v2284_v6 = vsel %vm2281_vm5, %v2283_v51, %v2279_v1  ;;  %v1460_v24 = vsub.f32 %v4018_v48, %v1402_v61  ;;  %3050 = vmatpush.xpose.msk.msra.mxu3 %vm213_vm0, %v1656_v15 }
 0x2f9   :  { %v2285_v37 = vmul.f32 %v2284_v6, %v1733_v34  ;;  %v1466_v48 = vsub.f32 %v4021_v54, %v1420_v17 }
 0x2fa   :  { %v4148_v20 = vpop.eup %3145  ;;  %v1510_v52 = vmul.f32 1.442695, %v1460_v24 }
 0x2fb   :  { %v4150_v9 = vpop.eup %3147  ;;  %3036 = vmatmul.msk.f32.gmra.mxu3 %vm213_vm0, %v4148_v20  ;;  %2710 = vrot.lane.b32.xlu2 %v2285_v37, %s3390_s9  ;;  %v1522_v53 = vmul.f32 1.442695, %v1466_v48 }
 0x2fc   :  { %3149 = vpow2.f32 %v1510_v52  ;;  %3047 = vmatmul.msk.f32.vlgmr.msra.gmra.mxu2 %vm213_vm0, %v4150_v9 }
 0x2fd   :  { %3151 = vpow2.f32 %v1516_v59  ;;  %3061 = vmatpush.xpose.msk.msra.mxu2 %vm213_vm0, %v1663_v26 }
 0x2ff   :  { %v1405_v18 = vpop.xlane.xlu1 %1404 }
 0x300   :  { %v1552_v5 = vpop.xlane.xlu0 %1551  ;;  %v1461_v23 = vsub.f32 %v4030_v63, %v1405_v18  ;;  %v1423_v11 = vpop.xlane.xlu2 %1422  ;;  %v1660_v63 = vld [vmem:[#allocation8 + $0xd0] sm:$0xff] }
 0x301   :  { %3153 = vrcp.f32 %v1552_v5  ;;  %3062 = vmatpush.xpose.msk.msra.mxu2 %vm213_vm0, %v1662_v33  ;;  %v1467_v54 = vsub.f32 %v4033_v50, %v1423_v11  ;;  %v2297_v28 = vand.u32 2147483648, %v1552_v5  ;;  %v2295_v50 = vand.u32 2147483647, %v1552_v5 }
 0x302   :  { %v4161_v43 = vpop.eup %3149  ;;  %v1512_v62 = vmul.f32 1.442695, %v1461_v23  ;;  %vm2291_vm7 = vweird.f32 %v1552_v5 }
 0x303   :  { %v4163_v32 = vpop.eup %3151  ;;  %3043 = vmatmul.msk.f32.vlgmr.msrb.gmra.mxu3 %vm213_vm0, %v4161_v43  ;;  %v1524_v0 = vmul.f32 1.442695, %v1467_v54  ;;  %v2298_v42 = vor.u32 1.1754944e-38, %v2297_v28  ;;  %vm2296_vm9 = vcmp.eq.f32.partialorder %v2295_v50, 8.507059e+37 }
 0x304   :  { %3155 = vpow2.f32 %v1512_v62  ;;  %3048 = vmatmul.msk.f32.gmra.mxu2 %vm213_vm0, %v4163_v32  ;;  %3057 = vmatpush.xpose.msk.msrb.mxu3 %vm213_vm0, %v1661_v25  ;;  %v1580_v62 = vsel %vm213_vm0, %v4139_v38, 0.0  ;;  %v1598_v38 = vsel %vm213_vm0, %v4150_v9, 0.0 }
 0x305   :  { %3157 = vpow2.f32 %v1522_v53 }
 0x306   :  { %v1765_v45 = vpop.f32.mrf.mxu2 }
 0x307   :  { %v3154_v57 = vpop.eup %3153  ;;  %v4171_v3 = vpop.xlane.xlu1 %1554 }
 0x308   :  { %v2287_v39 = vmul.f32 %v3154_v57, %v1552_v5  ;;  %v1414_v58 = vpop.xlane.xlu0 %1413  ;;  %3058 = vmatpush.xpose.msk.msrb.mxu3 %vm213_vm0, %v1660_v63  ;;  %vm2292_vm6 = vweird.f32 %v3154_v57  ;;  %v1583_v5 = vsel %vm213_vm0, %v4148_v20, 0.0  ;;  %v1601_v20 = vsel %vm213_vm0, %v4163_v32, 0.0 }
 0x309   :  { %v1464_v10 = vsub.f32 %v4042_v35, %v1414_v58  ;;  %vm2293_vm8 = vmor %vm2291_vm7, %vm2292_vm6  ;;  %v1592_v32 = vsel %vm213_vm0, %v4161_v43, 0.0  ;;  %v2312_v50 = vand.u32 2147483648, %v4171_v3  ;;  %vm2306_vm11 = vweird.f32 %v4171_v3 }
 0x30a   :  { %v2288_v19 = vsub.f32 1.0, %v2287_v39  ;;  %v4175_v2 = vpop.eup %3155 }
 0x30b   :  { %v1518_v4 = vmul.f32 1.442695, %v1464_v10  ;;  %v4177_v55 = vpop.eup %3157  ;;  %3044 = vmatmul.msk.f32.gmra.mxu3 %vm213_vm0, %v4175_v2  ;;  %v1595_v58 = vsel %vm213_vm0, %v4175_v2, 0.0 }
 0x30c   :  { %v2289_v16 = vmul.f32 %v3154_v57, %v2288_v19  ;;  %3055 = vmatmul.msk.f32.vlgmr.msrb.gmra.mxu2 %vm213_vm0, %v4177_v55 }
 0x30d   :  { %3159 = vpow2.f32 %v1518_v4 }
 0x30e   :  { %3161 = vpow2.f32 %v1524_v0  ;;  %v2290_v35 = vadd.f32 %v3154_v57, %v2289_v16  ;;  %v1768_v10 = vpop.f32.mrf.mxu2 }
 0x30f   :  { %v1417_v44 = vpop.xlane.xlu2 %1416  ;;  %v1432_v12 = vpop.xlane.xlu1 %1431 }
 0x310   :  { %v2294_v31 = vsel %vm2293_vm8, %v3154_v57, %v2290_v35  ;;  %v1465_v49 = vsub.f32 %v4052_v47, %v1417_v44  ;;  %v1470_v21 = vsub.f32 %v4048_v14, %v1432_v12  ;;  %v1435_v1 = vpop.xlane.xlu0 %1434  ;;  %v1664_v47 = vld [vmem:[#allocation8 + $0xf0] sm:$0xff]  ;;  %v2310_v35 = vand.u32 2147483647, %v4171_v3 }
 0x311   :  { %v2299_v22 = vsel %vm2296_vm9, %v2298_v42, %v2294_v31  ;;  %v1471_v14 = vsub.f32 %v4055_v60, %v1435_v1  ;;  %v1571_v60 = vsel %vm213_vm0, %v4127_v13, 0.0  ;;  %v1589_v13 = vsel %vm213_vm0, %v4130_v36, 0.0 }
 0x312   :  { %v2300_v41 = vmul.f32 %v2299_v22, %v1765_v45  ;;  %v1520_v15 = vmul.f32 1.442695, %v1465_v49  ;;  %v1530_v51 = vmul.f32 1.442695, %v1470_v21  ;;  %v2313_v45 = vor.u32 1.1754944e-38, %v2312_v50 }
 0x313   :  { %v4185_v8 = vpop.eup %3159  ;;  %v1532_v6 = vmul.f32 1.442695, %v1471_v14  ;;  %vm2311_vm13 = vcmp.eq.f32.partialorder %v2310_v35, 8.507059e+37 }
 0x314   :  { %v4187_v61 = vpop.eup %3161  ;;  %3051 = vmatmul.msk.f32.vlgmr.msra.gmra.mxu3 %vm213_vm0, %v4185_v8  ;;  %2716 = vrot.lane.b32.xlu0 %v2300_v41, %s3391_s10  ;;  %3163 = vpow2.f32 %v1520_v15  ;;  %v1604_v44 = vsel %vm213_vm0, %v4185_v8, 0.0 }
 0x315   :  { %3056 = vmatmul.msk.f32.gmra.mxu2 %vm213_vm0, %v4187_v61  ;;  %3065 = vmatpush.xpose.msk.msra.mxu3 %vm213_vm0, %v1665_v56  ;;  %3165 = vpow2.f32 %v1530_v51  ;;  %v1613_v0 = vsel %vm213_vm0, %v4187_v61, 0.0 }
 0x317   :  { %v1426_v17 = vpop.xlane.xlu1 %1425  ;;  %v4205_v52 = vpop.xlane.xlu2 %1557 }
 0x318   :  { %v1468_v34 = vsub.f32 %v4066_v30, %v1426_v17  ;;  %vm2321_vm15 = vweird.f32 %v4205_v52 }
 0x319   :  { %3066 = vmatpush.xpose.msk.msra.mxu3 %vm213_vm0, %v1664_v47 }
 0x31a   :  { %v3164_v24 = vpop.eup %3163  ;;  %v1526_v37 = vmul.f32 1.442695, %v1468_v34 }
 0x31b   :  { %v4198_v59 = vpop.eup %3165  ;;  %v1607_v43 = vsel %vm213_vm0, %v3164_v24, 0.0 }
 0x31c   :  { %3052 = vmatmul.msk.f32.gmra.mxu3 %vm213_vm0, %v3164_v24  ;;  %3167 = vpow2.f32 %v1526_v37  ;;  %v1622_v61 = vsel %vm213_vm0, %v4198_v59, 0.0 }
 0x31d   :  { %3063 = vmatmul.msk.f32.vlgmr.msra.gmra.mxu2 %vm213_vm0, %v4198_v59  ;;  %3169 = vpow2.f32 %v1532_v6  ;;  %1572 = vadd.xlane.f32.xlu1 %v1571_v60  ;;  %v2325_v59 = vand.u32 2147483647, %v4205_v52 }
 0x31f   :  { %v1429_v30 = vpop.xlane.xlu0 %1428  ;;  %vm2326_vm4 = vcmp.eq.f32.partialorder %v2325_v59, 8.507059e+37 }
 0x320   :  { %v1469_v26 = vsub.f32 %v4074_v29, %v1429_v30  ;;  %v2327_v30 = vand.u32 2147483648, %v4205_v52 }
 0x322   :  { %v3168_v48 = vpop.eup %3167  ;;  %v1528_v33 = vmul.f32 1.442695, %v1469_v26 }
 0x323   :  { %v3170_v18 = vpop.eup %3169  ;;  %v1616_v12 = vsel %vm213_vm0, %v3168_v48, 0.0 }
 0x324   :  { %3059 = vmatmul.msk.f32.vlgmr.msrb.gmra.mxu3 %vm213_vm0, %v3168_v48  ;;  %3171 = vpow2.f32 %v1528_v33  ;;  %1584 = vadd.xlane.f32.xlu2 %v1583_v5  ;;  %v1625_v28 = vsel %vm213_vm0, %v3170_v18, 0.0 }
 0x325   :  { %3064 = vmatmul.msk.f32.gmra.mxu2 %vm213_vm0, %v3170_v18  ;;  %1590 = vadd.xlane.f32.xlu1 %v1589_v13 }
 0x326   :  { %v1800_v26 = vpop.f32.mrf.mxu3 }
 0x327   :  { %v1438_v23 = vpop.xlane.xlu2 %1437  ;;  %v4247_v4 = vpop.xlane.xlu0 %1560 }
 0x328   :  { %v1472_v53 = vsub.f32 %v4081_v27, %v1438_v23  ;;  %v2342_v23 = vand.u32 2147483648, %v4247_v4  ;;  %vm2336_vm3 = vweird.f32 %v4247_v4 }
 0x32a   :  { %v4215_v29 = vpop.eup %3171  ;;  %v1534_v25 = vmul.f32 1.442695, %v1472_v53 }
 0x32c   :  { %3060 = vmatmul.msk.f32.gmra.mxu3 %vm213_vm0, %v4215_v29  ;;  %3173 = vpow2.f32 %v1534_v25  ;;  %1602 = vadd.xlane.f32.xlu2 %v1601_v20  ;;  %v2328_v25 = vor.u32 1.1754944e-38, %v2327_v30  ;;  %v2340_v20 = vand.u32 2147483647, %v4247_v4 }
 0x32d   :  { %1581 = vadd.xlane.f32.xlu1 %v1580_v62  ;;  %3175 = vrcp.f32 %v4171_v3 }
 0x32e   :  { %vm2341_vm7 = vcmp.eq.f32.partialorder %v2340_v20, 8.507059e+37 }
 0x32f   :  { %v1441_v36 = vpop.xlane.xlu1 %1440 }
 0x330   :  { %v1473_v11 = vsub.f32 %v4089_v7, %v1441_v36  ;;  %v1610_v7 = vsel %vm213_vm0, %v4177_v55, 0.0 }
 0x332   :  { %v4224_v54 = vpop.eup %3173  ;;  %v1536_v27 = vmul.f32 1.442695, %v1473_v11 }
 0x333   :  { %v3176_v63 = vpop.eup %3175  ;;  %v1628_v30 = vsel %vm213_vm0, %v4224_v54, 0.0 }
 0x334   :  { %3067 = vmatmul.msk.f32.vlgmr.msra.gmra.mxu3 %vm213_vm0, %v4224_v54  ;;  %3177 = vpow2.f32 %v1536_v27  ;;  %1593 = vadd.xlane.f32.xlu2 %v1592_v32  ;;  %v2302_v39 = vmul.f32 %v3176_v63, %v4171_v3  ;;  %vm2307_vm10 = vweird.f32 %v3176_v63  ;;  %v2343_v27 = vor.u32 1.1754944e-38, %v2342_v23 }
 0x335   :  { %1599 = vadd.xlane.f32.xlu1 %v1598_v38  ;;  %3179 = vrcp.f32 %v4205_v52  ;;  %vm2308_vm12 = vmor %vm2306_vm11, %vm2307_vm10  ;;  %vm2818_vm10 = vcmask 130048  }
 0x336   :  { %v2303_v9 = vsub.f32 1.0, %v2302_v39  ;;  %3181 = vrcp.f32 %v4247_v4 }
 0x337   :  { %v4290_v5 = vpop.xlane.xlu1 %1563 }
 0x338   :  { %v2304_v19 = vmul.f32 %v3176_v63, %v2303_v9  ;;  %v2357_v20 = vand.u32 2147483648, %v4290_v5 }
 0x33a   :  { %v4233_v57 = vpop.eup %3177  ;;  %v2305_v55 = vadd.f32 %v3176_v63, %v2304_v19  ;;  %v1803_v19 = vpop.f32.mrf.mxu3 }
 0x33b   :  { %v3180_v42 = vpop.eup %3179 }
 0x33c   :  { %3068 = vmatmul.msk.f32.gmra.mxu3 %vm213_vm0, %v4233_v57  ;;  %1611 = vadd.xlane.f32.xlu2 %v1610_v7  ;;  %v2309_v31 = vsel %vm2308_vm12, %v3176_v63, %v2305_v55  ;;  %v3182_v22 = vpop.eup %3181  ;;  %v2317_v49 = vmul.f32 %v3180_v42, %v4205_v52  ;;  %vm2322_vm14 = vweird.f32 %v3180_v42 }
 0x33d   :  { %1608 = vadd.xlane.f32.xlu1 %v1607_v43  ;;  %v2314_v21 = vsel %vm2311_vm13, %v2313_v45, %v2309_v31  ;;  %v2332_v3 = vmul.f32 %v3182_v22, %v4247_v4  ;;  %vm4286_vm1 = vmor %vm2321_vm15, %vm2322_vm14  ;;  %vm2337_vm2 = vweird.f32 %v3182_v22 }
 0x33e   :  { %1596 = vadd.xlane.f32.xlu0 %v1595_v58  ;;  %v2315_v56 = vmul.f32 %v2314_v21, %v1768_v10  ;;  %v2318_v15 = vsub.f32 1.0, %v2317_v49  ;;  %vm2338_vm5 = vmor %vm2336_vm3, %vm2337_vm2 }
 0x33f   :  { %v2333_v14 = vsub.f32 1.0, %v2332_v3 }
 0x340   :  { %v4250_v2 = vpop.xlane.xlu2 %1566  ;;  %v2319_v47 = vmul.f32 %v3180_v42, %v2318_v15 }
 0x341   :  { %3183 = vrcp.f32 %v4250_v2  ;;  %v2334_v6 = vmul.f32 %v3182_v22, %v2333_v14  ;;  %v2372_v63 = vand.u32 2147483648, %v4250_v2  ;;  %vm2366_vm8 = vweird.f32 %v4250_v2 }
 0x342   :  { %v2320_v24 = vadd.f32 %v3180_v42, %v2319_v47  ;;  %v2370_v43 = vand.u32 2147483647, %v4250_v2 }
 0x343   :  { %v2335_v18 = vadd.f32 %v3182_v22, %v2334_v6  ;;  %v2373_v50 = vor.u32 1.1754944e-38, %v2372_v63  ;;  %v1619_v6 = vsel %vm213_vm0, %v4215_v29, 0.0 }
 0x344   :  { %v2324_v13 = vsel %vm4286_vm1, %v3180_v42, %v2320_v24  ;;  %vm2371_vm11 = vcmp.eq.f32.partialorder %v2370_v43, 8.507059e+37 }
 0x345   :  { %1626 = vadd.xlane.f32.xlu1 %v1625_v28  ;;  %v2329_v36 = vsel %vm2326_vm4, %v2328_v25, %v2324_v13  ;;  %v2339_v11 = vsel %vm2338_vm5, %v3182_v22, %v2335_v18 }
 0x346   :  { %1614 = vadd.xlane.f32.xlu0 %v1613_v0  ;;  %v4252_v16 = vpop.f32.mrf.mxu2  ;;  %v2330_v7 = vmul.f32 %v2329_v36, %v1800_v26  ;;  %v2344_v39 = vsel %vm2341_vm7, %v2343_v27, %v2339_v11  ;;  %v2355_v11 = vand.u32 2147483647, %v4290_v5  ;;  %v1631_v27 = vsel %vm213_vm0, %v4233_v57, 0.0 }
 0x347   :  { %v4269_v1 = vpop.eup %3183 }
 0x348   :  { %v4265_v51 = vpop.xlane.xlu2 %1575  ;;  %v2362_v17 = vmul.f32 %v4269_v1, %v4250_v2  ;;  %vm2367_vm6 = vweird.f32 %v4269_v1  ;;  %v2345_v2 = vmul.f32 %v2344_v39, %v1803_v19 }
 0x349   :  { %3185 = vrcp.f32 %v4265_v51  ;;  %vm4305_vm9 = vmor %vm2366_vm8, %vm2367_vm6  ;;  %v2417_v45 = vand.u32 2147483648, %v4265_v51  ;;  %vm2411_vm14 = vweird.f32 %v4265_v51  ;;  %v2415_v21 = vand.u32 2147483647, %v4265_v51 }
 0x34a   :  { %v2363_v37 = vsub.f32 1.0, %v2362_v17  ;;  %vm2351_vm6 = vweird.f32 %v4290_v5  ;;  %vm2356_vm8 = vcmp.eq.f32.partialorder %v2355_v11, 8.507059e+37 }
 0x34b   :  { %vm2416_vm4 = vcmp.eq.f32.partialorder %v2415_v21, 8.507059e+37 }
 0x34c   :  { %v2364_v52 = vmul.f32 %v4269_v1, %v2363_v37 }
 0x34d   :  { %1617 = vadd.xlane.f32.xlu1 %v1616_v12 }
 0x34e   :  { %1605 = vadd.xlane.f32.xlu0 %v1604_v44  ;;  %v2365_v38 = vadd.f32 %v4269_v1, %v2364_v52 }
 0x34f   :  { %v4262_v41 = vpop.xlane.xlu0 %1578  ;;  %v4267_v8 = vpop.f32.mrf.mxu2 }
 0x350   :  { %v4279_v60 = vpop.eup %3185  ;;  %v2369_v0 = vsel %vm4305_vm9, %v4269_v1, %v2365_v38  ;;  %v2418_v1 = vor.u32 1.1754944e-38, %v2417_v45  ;;  %v2430_v19 = vand.u32 2147483647, %v4262_v41 }
 0x351   :  { %v2407_v53 = vmul.f32 %v4279_v60, %v4265_v51  ;;  %v2374_v42 = vsel %vm2371_vm11, %v2373_v50, %v2369_v0  ;;  %vm2412_vm12 = vweird.f32 %v4279_v60  ;;  %v2432_v50 = vand.u32 2147483648, %v4262_v41 }
 0x352   :  { %v2375_v49 = vmul.f32 %v2374_v42, %v4267_v8  ;;  %vm2413_vm15 = vmor %vm2411_vm14, %vm2412_vm12  ;;  %vm2426_vm12 = vweird.f32 %v4262_v41 }
 0x353   :  { %v2408_v32 = vsub.f32 1.0, %v2407_v53 }
 0x354   :  { %2718 = vrot.lane.b32.xlu2 %v2315_v56, %s3391_s10 }
 0x355   :  { %v2409_v28 = vmul.f32 %v4279_v60, %v2408_v32  ;;  %v4352_v23 = vpop.permute.xlu2 %2710 }
 0x356   :  { %1623 = vadd.xlane.f32.xlu0 %v1622_v61 }
 0x357   :  { %v4284_v48 = vpop.f32.mrf.mxu2  ;;  %v2410_v44 = vadd.f32 %v4279_v60, %v2409_v28 }
 0x358   :  { %v4277_v34 = vpop.xlane.xlu0 %1569 }
 0x359   :  { %v2414_v56 = vsel %vm2413_vm15, %v4279_v60, %v2410_v44  ;;  %vm2381_vm15 = vweird.f32 %v4277_v34 }
 0x35a   :  { %v2419_v47 = vsel %vm2416_vm4, %v2418_v1, %v2414_v56  ;;  %v2433_v56 = vor.u32 1.1754944e-38, %v2432_v50 }
 0x35b   :  { %v2420_v51 = vmul.f32 %v2419_v47, %v4284_v48 }
 0x35f   :  { %v4313_v4 = vpop.f32.mrf.mxu2 }
 0x360   :  { %v1588_v62 = vpop.xlane.xlu0 %1587 }
 0x361   :  { %3187 = vrcp.f32 %v1588_v62  ;;  %v2477_v12 = vand.u32 2147483648, %v1588_v62  ;;  %vm2471_vm1 = vweird.f32 %v1588_v62 }
 0x362   :  { %3189 = vrcp.f32 %v4290_v5 }
 0x363   :  { %v2478_v15 = vor.u32 1.1754944e-38, %v2477_v12  ;;  %3191 = vrcp.f32 %v4262_v41  ;;  %v2387_v12 = vand.u32 2147483648, %v4277_v34 }
 0x364   :  { %3193 = vrcp.f32 %v4277_v34 }
 0x365   :  { %v2709_v9 = vpop.permute.xlu1 %2708 }
 0x366   :  { %v2819_v55 = vsel %vm2818_vm10, %v4107_v40, %v2709_v9  ;;  %2724 = vrot.lane.b32.xlu1 %v2330_v7, %s3392_s11  ;;  %v2475_v40 = vand.u32 2147483647, %v1588_v62  ;;  %v4334_v24 = vpop.f32.mrf.mxu3  ;;  %v2358_v7 = vor.u32 1.1754944e-38, %v2357_v20 }
 0x367   :  { %v3188_v10 = vpop.eup %3187  ;;  %v1975_v14 = vpop.f32.mrf.mxu2 }
 0x368   :  { %v2467_v35 = vmul.f32 %v3188_v10, %v1588_v62  ;;  %vm2472_vm13 = vweird.f32 %v3188_v10  ;;  %vm2476_vm3 = vcmp.eq.f32.partialorder %v2475_v40, 8.507059e+37  ;;  %v3190_v37 = vpop.eup %3189 }
 0x369   :  { %vm2473_vm2 = vmor %vm2471_vm1, %vm2472_vm13  ;;  %v2347_v60 = vmul.f32 %v3190_v37, %v4290_v5  ;;  %v4346_v33 = vpop.eup %3191  ;;  %vm2352_vm5 = vweird.f32 %v3190_v37  ;;  %vm4390_vm13 = vcmp.eq.f32.partialorder %v2430_v19, 8.507059e+37 }
 0x36a   :  { %v2468_v31 = vsub.f32 1.0, %v2467_v35  ;;  %2726 = vrot.lane.b32.xlu0 %v2345_v2, %s3392_s11  ;;  %v4348_v13 = vpop.eup %3193  ;;  %v2422_v54 = vmul.f32 %v4346_v33, %v4262_v41  ;;  %vm2353_vm7 = vmor %vm2351_vm6, %vm2352_vm5  ;;  %vm2427_vm9 = vweird.f32 %v4346_v33  ;;  %v2385_v35 = vand.u32 2147483647, %v4277_v34 }
 0x36b   :  { %v2348_v29 = vsub.f32 1.0, %v2347_v60  ;;  %v2377_v52 = vmul.f32 %v4348_v13, %v4277_v34  ;;  %vm2382_vm11 = vweird.f32 %v4348_v13  ;;  %vm4399_vm14 = vmor %vm2426_vm12, %vm2427_vm9 }
 0x36c   :  { %v2469_v22 = vmul.f32 %v3188_v10, %v2468_v31  ;;  %v2423_v32 = vsub.f32 1.0, %v2422_v54 }
 0x36d   :  { %v2349_v18 = vmul.f32 %v3190_v37, %v2348_v29  ;;  %v2378_v63 = vsub.f32 1.0, %v2377_v52 }
 0x36e   :  { %v2470_v3 = vadd.f32 %v3188_v10, %v2469_v22  ;;  %2734 = vrot.lane.b32.xlu1 %v2375_v49, %s3393_s12  ;;  %v4344_v48 = vpop.f32.mrf.mxu3  ;;  %v2424_v58 = vmul.f32 %v4346_v33, %v2423_v32 }
 0x36f   :  { %v2350_v53 = vadd.f32 %v3190_v37, %v2349_v18  ;;  %v4359_v62 = vpop.f32.mrf.mxu2 }
 0x370   :  { %v2474_v61 = vsel %vm2473_vm2, %v3188_v10, %v2470_v3  ;;  %v2379_v10 = vmul.f32 %v4348_v13, %v2378_v63  ;;  %v2425_v2 = vadd.f32 %v4346_v33, %v2424_v58  ;;  %vm4412_vm2 = vmor %vm2381_vm15, %vm2382_vm11  ;;  %v4457_v63 = vsel %vm2818_vm10, %v4104_v46, %v4352_v23 }
 0x371   :  { %v2479_v8 = vsel %vm2476_vm3, %v2478_v15, %v2474_v61  ;;  %v2354_v38 = vsel %vm2353_vm7, %v3190_v37, %v2350_v53  ;;  %vm4416_vm3 = vcmp.eq.f32.partialorder %v2385_v35, 8.507059e+37 }
 0x372   :  { %v4327_v17 = vmul.f32 %v2479_v8, %v1975_v14  ;;  %v2359_v43 = vsel %vm2356_vm8, %v2358_v7, %v2354_v38  ;;  %v2380_v31 = vadd.f32 %v4348_v13, %v2379_v10  ;;  %v2429_v3 = vsel %vm4399_vm14, %v4346_v33, %v2425_v2 }
 0x373   :  { %v2360_v28 = vmul.f32 %v2359_v43, %v4252_v16  ;;  %v2434_v60 = vsel %vm4390_vm13, %v2433_v56, %v2429_v3 }
 0x374   :  { %v2384_v14 = vsel %vm4412_vm2, %v4348_v13, %v2380_v31 }
 0x376   :  { %2748 = vrot.lane.b32.xlu1 %v2420_v51, %s3394_s13  ;;  %v4361_v36 = vpop.f32.mrf.mxu3  ;;  %v2388_v51 = vor.u32 1.1754944e-38, %v2387_v12 }
 0x378   :  { %v2389_v29 = vsel %vm4416_vm3, %v2388_v51, %v2384_v14 }
 0x37d   :  { %1620 = vadd.xlane.f32.xlu2 %v1619_v6 }
 0x37e   :  { %v4385_v42 = vpop.f32.mrf.mxu3 }
 0x37f   :  { %v4377_v0 = vpop.f32.mrf.mxu2 }
 0x385   :  { %1629 = vadd.xlane.f32.xlu2 %v1628_v30 }
 0x386   :  { %v2717_v26 = vpop.permute.xlu0 %2716  ;;  %v4447_v20 = vpop.f32.mrf.mxu3 }
 0x387   :  { %v4341_v59 = vsel %vm213_vm0, %v2819_v55, %v2717_v26  ;;  %v4439_v33 = vpop.f32.mrf.mxu2 }
 0x38e   :  { %v4525_v1 = vpop.f32.mrf.mxu3 }
 0x38f   :  { %v4507_v40 = vpop.f32.mrf.mxu2 }
 0x390   :  { %v4356_v25 = vpop.xlane.xlu1 %1572 }
 0x391   :  { %3195 = vrcp.f32 %v4356_v25  ;;  %v2402_v45 = vand.u32 2147483648, %v4356_v25  ;;  %v2400_v41 = vand.u32 2147483647, %v4356_v25  ;;  %vm2396_vm4 = vweird.f32 %v4356_v25 }
 0x393   :  { %v2403_v6 = vor.u32 1.1754944e-38, %v2402_v45  ;;  %vm2401_vm6 = vcmp.eq.f32.partialorder %v2400_v41, 8.507059e+37 }
 0x394   :  { %1632 = vadd.xlane.f32.xlu0 %v1631_v27 }
 0x397   :  { %v3196_v39 = vpop.eup %3195  ;;  %v4369_v9 = vpop.xlane.xlu2 %1584 }
 0x398   :  { %v2392_v5 = vmul.f32 %v3196_v39, %v4356_v25  ;;  %3197 = vrcp.f32 %v4369_v9  ;;  %v4374_v57 = vpop.xlane.xlu1 %1590  ;;  %vm2397_vm1 = vweird.f32 %v3196_v39  ;;  %v2462_v13 = vand.u32 2147483648, %v4369_v9 }
 0x399   :  { %3199 = vrcp.f32 %v4374_v57  ;;  %vm2398_vm5 = vmor %vm2396_vm4, %vm2397_vm1  ;;  %v2435_v25 = vmul.f32 %v2434_v60, %v4313_v4  ;;  %v2490_v11 = vand.u32 2147483647, %v4374_v57  ;;  %v2460_v32 = vand.u32 2147483647, %v4369_v9 }
 0x39a   :  { %v2393_v55 = vsub.f32 1.0, %v2392_v5  ;;  %vm2456_vm8 = vweird.f32 %v4369_v9  ;;  %vm2486_vm9 = vweird.f32 %v4374_v57  ;;  %v2463_v7 = vor.u32 1.1754944e-38, %v2462_v13 }
 0x39b   :  { %vm4487_vm13 = vcmp.eq.f32.partialorder %v2490_v11, 8.507059e+37  ;;  %vm2461_vm14 = vcmp.eq.f32.partialorder %v2460_v32, 8.507059e+37 }
 0x39c   :  { %v2394_v44 = vmul.f32 %v3196_v39, %v2393_v55 }
 0x39d   :  { %2732 = vrot.lane.b32.xlu2 %v2360_v28, %s3393_s12 }
 0x39e   :  { %v4397_v22 = vpop.eup %3197  ;;  %v2395_v49 = vadd.f32 %v3196_v39, %v2394_v44 }
 0x39f   :  { %v4405_v21 = vpop.eup %3199  ;;  %v2452_v34 = vmul.f32 %v4397_v22, %v4369_v9  ;;  %v4422_v61 = vpop.xlane.xlu2 %1602  ;;  %vm2457_vm7 = vweird.f32 %v4397_v22 }
 0x3a0   :  { %v2482_v8 = vmul.f32 %v4405_v21, %v4374_v57  ;;  %3201 = vrcp.f32 %v4422_v61  ;;  %v4431_v47 = vpop.xlane.xlu1 %1581  ;;  %v2399_v26 = vsel %vm2398_vm5, %v3196_v39, %v2395_v49  ;;  %vm2487_vm11 = vweird.f32 %v4405_v21  ;;  %vm4474_vm12 = vmor %vm2456_vm8, %vm2457_vm7 }
 0x3a1   :  { %v2453_v37 = vsub.f32 1.0, %v2452_v34  ;;  %3203 = vrcp.f32 %v4431_v47  ;;  %v2404_v54 = vsel %vm2401_vm6, %v2403_v6, %v2399_v26  ;;  %v2492_v39 = vand.u32 2147483648, %v4374_v57  ;;  %vm2488_vm15 = vmor %vm2486_vm9, %vm2487_vm11 }
 0x3a2   :  { %v2483_v30 = vsub.f32 1.0, %v2482_v8  ;;  %v2405_v52 = vmul.f32 %v2404_v54, %v4344_v48  ;;  %v2390_v48 = vmul.f32 %v2389_v29, %v4334_v24  ;;  %v2552_v28 = vand.u32 2147483648, %v4422_v61 }
 0x3a3   :  { %v2454_v18 = vmul.f32 %v4397_v22, %v2453_v37  ;;  %v2447_v2 = vand.u32 2147483648, %v4431_v47  ;;  %v2550_v50 = vand.u32 2147483647, %v4422_v61  ;;  %v2493_v35 = vor.u32 1.1754944e-38, %v2492_v39 }
 0x3a4   :  { %v2484_v53 = vmul.f32 %v4405_v21, %v2483_v30  ;;  %v2445_v44 = vand.u32 2147483647, %v4431_v47  ;;  %vm2546_vm2 = vweird.f32 %v4422_v61  ;;  %vm2441_vm3 = vweird.f32 %v4431_v47 }
 0x3a5   :  { %v2455_v27 = vadd.f32 %v4397_v22, %v2454_v18  ;;  %2742 = vrot.lane.b32.xlu2 %v2405_v52, %s3395_s14  ;;  %v2553_v3 = vor.u32 1.1754944e-38, %v2552_v28  ;;  %v2448_v56 = vor.u32 1.1754944e-38, %v2447_v2  ;;  %vm4516_vm4 = vcmp.eq.f32.partialorder %v2550_v50, 8.507059e+37 }
 0x3a6   :  { %v4452_v38 = vpop.eup %3201  ;;  %v2485_v43 = vadd.f32 %v4405_v21, %v2484_v53  ;;  %vm4542_vm7 = vcmp.eq.f32.partialorder %v2445_v44, 8.507059e+37  ;;  %v4633_v44 = vpop.f32.mrf.mxu3 }
 0x3a7   :  { %v4463_v4 = vpop.eup %3203  ;;  %v2542_v46 = vmul.f32 %v4452_v38, %v4422_v61  ;;  %v4469_v23 = vpop.xlane.xlu2 %1593  ;;  %v2459_v10 = vsel %vm4474_vm12, %v4397_v22, %v2455_v27  ;;  %vm2547_vm1 = vweird.f32 %v4452_v38 }
 0x3a8   :  { %2750 = vrot.lane.b32.xlu0 %v2435_v25, %s3394_s13  ;;  %v2437_v58 = vmul.f32 %v4463_v4, %v4431_v47  ;;  %3205 = vrcp.f32 %v4469_v23  ;;  %v4482_v9 = vpop.xlane.xlu1 %1599  ;;  %v2464_v16 = vsel %vm2461_vm14, %v2463_v7, %v2459_v10  ;;  %v2489_v22 = vsel %vm2488_vm15, %v4405_v21, %v2485_v43  ;;  %vm4537_vm5 = vmor %vm2546_vm2, %vm2547_vm1 }
 0x3a9   :  { %v2543_v19 = vsub.f32 1.0, %v2542_v46  ;;  %3207 = vrcp.f32 %v4482_v9  ;;  %v4504_v45 = vmul.f32 %v2464_v16, %v4385_v42  ;;  %v2494_v49 = vsel %vm4487_vm13, %v2493_v35, %v2489_v22 }
 0x3aa   :  { %v2438_v55 = vsub.f32 1.0, %v2437_v58  ;;  %v4521_v21 = vmul.f32 %v2494_v49, %v4359_v62  ;;  %v2507_v14 = vand.u32 2147483648, %v4469_v23  ;;  %vm2442_vm6 = vweird.f32 %v4463_v4  ;;  %v4600_v58 = vpop.f32.mrf.mxu2 }
 0x3ab   :  { %v2544_v31 = vmul.f32 %v4452_v38, %v2543_v19  ;;  %vm2501_vm8 = vweird.f32 %v4469_v23  ;;  %v2537_v29 = vand.u32 2147483648, %v4482_v9  ;;  %v2505_v13 = vand.u32 2147483647, %v4469_v23  ;;  %vm2443_vm11 = vmor %vm2441_vm3, %vm2442_vm6 }
 0x3ac   :  { %v2439_v12 = vmul.f32 %v4463_v4, %v2438_v55  ;;  %v2535_v54 = vand.u32 2147483647, %v4482_v9  ;;  %vm2531_vm9 = vweird.f32 %v4482_v9  ;;  %v2508_v25 = vor.u32 1.1754944e-38, %v2507_v14 }
 0x3ad   :  { %v2545_v57 = vadd.f32 %v4452_v38, %v2544_v31  ;;  %vm4589_vm15 = vcmp.eq.f32.partialorder %v2505_v13, 8.507059e+37 }
 0x3ae   :  { %v4514_v41 = vpop.eup %3205  ;;  %v2440_v30 = vadd.f32 %v4463_v4, %v2439_v12  ;;  %vm4594_vm1 = vcmp.eq.f32.partialorder %v2535_v54, 8.507059e+37 }
 0x3af   :  { %v4523_v15 = vpop.eup %3207  ;;  %v2497_v34 = vmul.f32 %v4514_v41, %v4469_v23  ;;  %v4530_v8 = vpop.xlane.xlu2 %1611  ;;  %v2549_v61 = vsel %vm4537_vm5, %v4452_v38, %v2545_v57  ;;  %vm2502_vm12 = vweird.f32 %v4514_v41  ;;  %v2538_v38 = vor.u32 1.1754944e-38, %v2537_v29 }
 0x3b0   :  { %2740 = vrot.lane.b32.xlu0 %v2390_v48, %s3395_s14  ;;  %v2527_v6 = vmul.f32 %v4523_v15, %v4482_v9  ;;  %3209 = vrcp.f32 %v4530_v8  ;;  %v4549_v37 = vpop.xlane.xlu1 %1608  ;;  %v2554_v52 = vsel %vm4516_vm4, %v2553_v3, %v2549_v61  ;;  %v2444_v32 = vsel %vm2443_vm11, %v4463_v4, %v2440_v30  ;;  %vm4585_vm14 = vmor %vm2501_vm8, %vm2502_vm12 }
 0x3b1   :  { %v4551_v60 = vpop.xlane.xlu0 %1596  ;;  %v2498_v26 = vsub.f32 1.0, %v2497_v34  ;;  %3211 = vrcp.f32 %v4549_v37  ;;  %v2555_v27 = vmul.f32 %v2554_v52, %v4439_v33  ;;  %v2449_v48 = vsel %vm4542_vm7, %v2448_v56, %v2444_v32 }
 0x3b2   :  { %v2528_v18 = vsub.f32 1.0, %v2527_v6  ;;  %3213 = vrcp.f32 %v4551_v60  ;;  %vm2532_vm13 = vweird.f32 %v4523_v15  ;;  %v2450_v47 = vmul.f32 %v2449_v48, %v4361_v36 }
 0x3b3   :  { %v2499_v53 = vmul.f32 %v4514_v41, %v2498_v26  ;;  %2774 = vrot.lane.b32.xlu1 %v2555_v27, %s3391_s10  ;;  %vm2591_vm2 = vweird.f32 %v4530_v8  ;;  %v2597_v23 = vand.u32 2147483648, %v4530_v8  ;;  %vm2576_vm3 = vweird.f32 %v4549_v37  ;;  %vm4629_vm4 = vmor %vm2531_vm9, %vm2532_vm13 }
 0x3b4   :  { %v2529_v11 = vmul.f32 %v4523_v15, %v2528_v18  ;;  %2756 = vrot.lane.b32.xlu2 %v2450_v47, %s3396_s15  ;;  %v2582_v57 = vand.u32 2147483648, %v4549_v37  ;;  %v2595_v9 = vand.u32 2147483647, %v4530_v8  ;;  %v2522_v14 = vand.u32 2147483648, %v4551_v60 }
 0x3b5   :  { %v2500_v7 = vadd.f32 %v4514_v41, %v2499_v53  ;;  %v2598_v56 = vor.u32 1.1754944e-38, %v2597_v23  ;;  %vm2516_vm7 = vweird.f32 %v4551_v60  ;;  %v2580_v61 = vand.u32 2147483647, %v4549_v37 }
 0x3b6   :  { %v4579_v39 = vpop.eup %3209  ;;  %v2530_v46 = vadd.f32 %v4523_v15, %v2529_v11  ;;  %v2583_v6 = vor.u32 1.1754944e-38, %v2582_v57  ;;  %vm2596_vm9 = vcmp.eq.f32.partialorder %v2595_v9, 8.507059e+37  ;;  %v2520_v29 = vand.u32 2147483647, %v4551_v60 }
 0x3b7   :  { %v4598_v43 = vpop.eup %3211  ;;  %v2587_v36 = vmul.f32 %v4579_v39, %v4530_v8  ;;  %v2719_v10 = vpop.permute.xlu2 %2718  ;;  %v2504_v5 = vsel %vm4585_vm14, %v4514_v41, %v2500_v7  ;;  %vm2592_vm5 = vweird.f32 %v4579_v39  ;;  %v2523_v11 = vor.u32 1.1754944e-38, %v2522_v14 }
 0x3b8   :  { %v4609_v19 = vpop.eup %3213  ;;  %v2572_v28 = vmul.f32 %v4598_v43, %v4549_v37  ;;  %v4617_v55 = vsel %vm213_vm0, %v4457_v63, %v2719_v10  ;;  %v4619_v2 = vpop.xlane.xlu1 %1626  ;;  %v2509_v35 = vsel %vm4589_vm15, %v2508_v25, %v2504_v5  ;;  %v2534_v12 = vsel %vm4629_vm4, %v4523_v15, %v2530_v46  ;;  %vm2593_vm8 = vmor %vm2591_vm2, %vm2592_vm5 }
 0x3b9   :  { %v4621_v50 = vpop.xlane.xlu0 %1614  ;;  %v2588_v16 = vsub.f32 1.0, %v2587_v36  ;;  %v2512_v63 = vmul.f32 %v4609_v19, %v4551_v60  ;;  %3215 = vrcp.f32 %v4619_v2  ;;  %v2510_v3 = vmul.f32 %v2509_v35, %v4447_v20  ;;  %v4680_v25 = vpop.f32.mrf.mxu2 }
 0x3ba   :  { %v2573_v22 = vsub.f32 1.0, %v2572_v28  ;;  %3217 = vrcp.f32 %v4621_v50  ;;  %v2539_v15 = vsel %vm4594_vm1, %v2538_v38, %v2534_v12  ;;  %vm2577_vm6 = vweird.f32 %v4598_v43  ;;  %v2083_v7 = vpop.f32.mrf.mxu3 }
 0x3bb   :  { %v2589_v49 = vmul.f32 %v4579_v39, %v2588_v16  ;;  %v2513_v41 = vsub.f32 1.0, %v2512_v63  ;;  %v2540_v62 = vmul.f32 %v2539_v15, %v4377_v0  ;;  %2764 = vrot.lane.b32.xlu1 %v2510_v3, %s3390_s9  ;;  %vm4664_vm11 = vmor %vm2576_vm3, %vm2577_vm6  ;;  %vm2517_vm12 = vweird.f32 %v4609_v19 }
 0x3bc   :  { %v2574_v42 = vmul.f32 %v4598_v43, %v2573_v22  ;;  %v2672_v27 = vand.u32 2147483648, %v4619_v2  ;;  %v2612_v48 = vand.u32 2147483648, %v4621_v50  ;;  %vm2581_vm13 = vcmp.eq.f32.partialorder %v2580_v61, 8.507059e+37  ;;  %vm2518_vm14 = vmor %vm2516_vm7, %vm2517_vm12 }
 0x3bd   :  { %v2514_v34 = vmul.f32 %v4609_v19, %v2513_v41  ;;  %v2590_v51 = vadd.f32 %v4579_v39, %v2589_v49  ;;  %2772 = vrot.lane.b32.xlu2 %v2540_v62, %s3391_s10  ;;  %vm2521_vm15 = vcmp.eq.f32.partialorder %v2520_v29, 8.507059e+37  ;;  %vm2666_vm2 = vweird.f32 %v4619_v2 }
 0x3be   :  { %v2575_v20 = vadd.f32 %v4598_v43, %v2574_v42  ;;  %v2670_v23 = vand.u32 2147483647, %v4619_v2  ;;  %v2610_v60 = vand.u32 2147483647, %v4621_v50  ;;  %vm2606_vm4 = vweird.f32 %v4621_v50 }
 0x3bf   :  { %v3216_v30 = vpop.eup %3215  ;;  %v2594_v26 = vsel %vm2593_vm8, %v4579_v39, %v2590_v51  ;;  %v2515_v52 = vadd.f32 %v4609_v19, %v2514_v34  ;;  %v2673_v31 = vor.u32 1.1754944e-38, %v2672_v27  ;;  %v2613_v16 = vor.u32 1.1754944e-38, %v2612_v48 }
 0x3c0   :  { %v3218_v8 = vpop.eup %3217  ;;  %v2662_v18 = vmul.f32 %v3216_v30, %v4619_v2  ;;  %v4672_v13 = vpop.xlane.xlu1 %1617  ;;  %v2599_v53 = vsel %vm2596_vm9, %v2598_v56, %v2594_v26  ;;  %v2579_v37 = vsel %vm4664_vm11, %v4598_v43, %v2575_v20  ;;  %vm2667_vm1 = vweird.f32 %v3216_v30 }
 0x3c1   :  { %v4674_v54 = vpop.xlane.xlu0 %1605  ;;  %v2602_v32 = vmul.f32 %v3218_v8, %v4621_v50  ;;  %3219 = vrcp.f32 %v4672_v13  ;;  %v2600_v47 = vmul.f32 %v2599_v53, %v4507_v40  ;;  %v2584_v33 = vsel %vm2581_vm13, %v2583_v6, %v2579_v37  ;;  %vm4699_vm5 = vmor %vm2666_vm2, %vm2667_vm1  ;;  %v2188_v41 = vpop.f32.mrf.mxu2 }
 0x3c2   :  { %v2663_v38 = vsub.f32 1.0, %v2662_v18  ;;  %3221 = vrcp.f32 %v4674_v54  ;;  %v2585_v46 = vmul.f32 %v2584_v33, %v2083_v7  ;;  %v2519_v24 = vsel %vm2518_vm14, %v4609_v19, %v2515_v52  ;;  %v2150_v53 = vpop.f32.mrf.mxu3 }
 0x3c3   :  { %v2603_v39 = vsub.f32 1.0, %v2602_v32  ;;  %v2524_v36 = vsel %vm2521_vm15, %v2523_v11, %v2519_v24  ;;  %2788 = vrot.lane.b32.xlu1 %v2600_v47, %s3393_s12  ;;  %vm2607_vm3 = vweird.f32 %v3218_v8  ;;  %v2627_v12 = vand.u32 2147483648, %v4672_v13 }
 0x3c4   :  { %v2664_v4 = vmul.f32 %v3216_v30, %v2663_v38  ;;  %v2525_v40 = vmul.f32 %v2524_v36, %v4525_v1  ;;  %vm2671_vm6 = vcmp.eq.f32.partialorder %v2670_v23, 8.507059e+37  ;;  %vm2608_vm7 = vmor %vm2606_vm4, %vm2607_vm3  ;;  %vm2611_vm8 = vcmp.eq.f32.partialorder %v2610_v60, 8.507059e+37 }
 0x3c5   :  { %v2604_v43 = vmul.f32 %v3218_v8, %v2603_v39  ;;  %2782 = vrot.lane.b32.xlu2 %v2585_v46, %s3392_s11  ;;  %v2567_v56 = vand.u32 2147483648, %v4674_v54  ;;  %v2625_v15 = vand.u32 2147483647, %v4672_v13  ;;  %v2565_v50 = vand.u32 2147483647, %v4674_v54 }
 0x3c6   :  { %v2665_v10 = vadd.f32 %v3216_v30, %v2664_v4  ;;  %2766 = vrot.lane.b32.xlu0 %v2525_v40, %s3390_s9  ;;  %vm2621_vm12 = vweird.f32 %v4672_v13  ;;  %v2628_v61 = vor.u32 1.1754944e-38, %v2627_v12  ;;  %vm2561_vm13 = vweird.f32 %v4674_v54 }
 0x3c7   :  { %v3220_v5 = vpop.eup %3219  ;;  %v2605_v28 = vadd.f32 %v3218_v8, %v2604_v43  ;;  %v2568_v26 = vor.u32 1.1754944e-38, %v2567_v56  ;;  %vm2626_vm15 = vcmp.eq.f32.partialorder %v2625_v15, 8.507059e+37  ;;  %vm2566_vm2 = vcmp.eq.f32.partialorder %v2565_v50, 8.507059e+37 }
 0x3c8   :  { %v3222_v35 = vpop.eup %3221  ;;  %v2617_v2 = vmul.f32 %v3220_v5, %v4672_v13  ;;  %v2669_v63 = vsel %vm4699_vm5, %v3216_v30, %v2665_v10  ;;  %vm2622_vm9 = vweird.f32 %v3220_v5 }
 0x3c9   :  { %v1624_v1 = vpop.xlane.xlu0 %1623  ;;  %v2557_v22 = vmul.f32 %v3222_v35, %v4674_v54  ;;  %v2674_v9 = vsel %vm2671_vm6, %v2673_v31, %v2669_v63  ;;  %v2609_v49 = vsel %vm2608_vm7, %v3218_v8, %v2605_v28  ;;  %vm2562_vm11 = vweird.f32 %v3222_v35  ;;  %vm2623_vm14 = vmor %vm2621_vm12, %vm2622_vm9 }
 0x3ca   :  { %3223 = vrcp.f32 %v1624_v1  ;;  %v2618_v57 = vsub.f32 1.0, %v2617_v2  ;;  %v2614_v42 = vsel %vm2611_vm8, %v2613_v16, %v2609_v49  ;;  %v2675_v14 = vmul.f32 %v2674_v9, %v2188_v41  ;;  %vm2563_vm1 = vmor %vm2561_vm13, %vm2562_vm11  ;;  %v2153_v19 = vpop.f32.mrf.mxu3 }
 0x3cb   :  { %v2558_v3 = vsub.f32 1.0, %v2557_v22  ;;  %v2615_v62 = vmul.f32 %v2614_v42, %v4600_v58  ;;  %v2657_v37 = vand.u32 2147483648, %v1624_v1  ;;  %v2655_v54 = vand.u32 2147483647, %v1624_v1 }
 0x3cc   :  { %v2619_v34 = vmul.f32 %v3220_v5, %v2618_v57  ;;  %vm2651_vm4 = vweird.f32 %v1624_v1  ;;  %vm2823_vm7 = vcmask 392192   ;;  %vm2826_vm8 = vcmask 523264  }
 0x3cd   :  { %v2559_v51 = vmul.f32 %v3222_v35, %v2558_v3  ;;  %2806 = vrot.lane.b32.xlu2 %v2675_v14, %s3394_s13  ;;  %v2658_v38 = vor.u32 1.1754944e-38, %v2657_v37  ;;  %vm2656_vm6 = vcmp.eq.f32.partialorder %v2655_v54, 8.507059e+37 }
 0x3ce   :  { %v2620_v6 = vadd.f32 %v3220_v5, %v2619_v34  ;;  %2790 = vrot.lane.b32.xlu0 %v2615_v62, %s3393_s12 }
 0x3cf   :  { %v2560_v30 = vadd.f32 %v3222_v35, %v2559_v51 }
 0x3d0   :  { %v3224_v20 = vpop.eup %3223  ;;  %v2624_v58 = vsel %vm2623_vm14, %v3220_v5, %v2620_v6 }
 0x3d1   :  { %v2647_v0 = vmul.f32 %v3224_v20, %v1624_v1  ;;  %v2629_v29 = vsel %vm2626_vm15, %v2628_v61, %v2624_v58  ;;  %v2564_v8 = vsel %vm2563_vm1, %v3222_v35, %v2560_v30  ;;  %vm2652_vm3 = vweird.f32 %v3224_v20 }
 0x3d2   :  { %v2569_v13 = vsel %vm2566_vm2, %v2568_v26, %v2564_v8  ;;  %v2630_v11 = vmul.f32 %v2629_v29, %v2150_v53  ;;  %vm2653_vm5 = vmor %vm2651_vm4, %vm2652_vm3  ;;  %vm2829_vm1 = vcmask 654336   ;;  %v2220_v42 = vpop.f32.mrf.mxu3 }
 0x3d3   :  { %v2648_v18 = vsub.f32 1.0, %v2647_v0  ;;  %v2570_v27 = vmul.f32 %v2569_v13, %v4633_v44 }
 0x3d5   :  { %v2649_v52 = vmul.f32 %v3224_v20, %v2648_v18  ;;  %2796 = vrot.lane.b32.xlu2 %v2630_v11, %s3395_s14 }
 0x3d6   :  { %2780 = vrot.lane.b32.xlu0 %v2570_v27, %s3392_s11 }
 0x3d7   :  { %v2650_v32 = vadd.f32 %v3224_v20, %v2649_v52 }
 0x3d8   :  { %v4725_v48 = vpop.permute.xlu1 %2724 }
 0x3d9   :  { %v2654_v7 = vsel %vm2653_vm5, %v3224_v20, %v2650_v32  ;;  %v2824_v13 = vsel %vm2823_vm7, %v4341_v59, %v4725_v48 }
 0x3da   :  { %v2659_v39 = vsel %vm2656_vm6, %v2658_v38, %v2654_v7  ;;  %v2223_v58 = vpop.f32.mrf.mxu3 }
 0x3db   :  { %v2660_v44 = vmul.f32 %v2659_v39, %v4680_v25 }
 0x3dc   :  { %v2727_v47 = vpop.permute.xlu0 %2726 }
 0x3dd   :  { %v2825_v33 = vsel %vm2823_vm7, %v4617_v55, %v2727_v47 }
 0x3de   :  { %2804 = vrot.lane.b32.xlu0 %v2660_v44, %s3394_s13 }
 0x3e0   :  { %v2735_v4 = vpop.permute.xlu1 %2734 }
 0x3e1   :  { %v2828_v46 = vsel %vm2826_vm8, %v2825_v33, %v2735_v4 }
 0x3e8   :  { %v2749_v54 = vpop.permute.xlu1 %2748 }
 0x3f0   :  { %v1621_v24 = vpop.xlane.xlu2 %1620 }
 0x3f1   :  { %3225 = vrcp.f32 %v1621_v24  ;;  %v2642_v10 = vand.u32 2147483648, %v1621_v24  ;;  %v2640_v5 = vand.u32 2147483647, %v1621_v24  ;;  %vm2636_vm11 = vweird.f32 %v1621_v24 }
 0x3f3   :  { %v2643_v28 = vor.u32 1.1754944e-38, %v2642_v10  ;;  %vm2641_vm13 = vcmp.eq.f32.partialorder %v2640_v5, 8.507059e+37 }
 0x3f7   :  { %v3226_v43 = vpop.eup %3225 }
 0x3f8   :  { %v2632_v36 = vmul.f32 %v3226_v43, %v1621_v24  ;;  %v1630_v23 = vpop.xlane.xlu2 %1629  ;;  %vm2637_vm9 = vweird.f32 %v3226_v43 }
 0x3f9   :  { %3227 = vrcp.f32 %v1630_v23  ;;  %vm2638_vm12 = vmor %vm2636_vm11, %vm2637_vm9  ;;  %v2687_v12 = vand.u32 2147483648, %v1630_v23  ;;  %v2685_v57 = vand.u32 2147483647, %v1630_v23  ;;  %vm2681_vm15 = vweird.f32 %v1630_v23 }
 0x3fa   :  { %v2633_v40 = vsub.f32 1.0, %v2632_v36  ;;  %vm2832_vm11 = vcmask 785408  }
 0x3fb   :  { %v2688_v41 = vor.u32 1.1754944e-38, %v2687_v12  ;;  %vm2686_vm3 = vcmp.eq.f32.partialorder %v2685_v57, 8.507059e+37 }
 0x3fc   :  { %v2634_v60 = vmul.f32 %v3226_v43, %v2633_v40 }
 0x3fe   :  { %v2635_v55 = vadd.f32 %v3226_v43, %v2634_v60 }
 0x3ff   :  { %v3228_v25 = vpop.eup %3227 }
 0x400   :  { %v2677_v35 = vmul.f32 %v3228_v25, %v1630_v23  ;;  %v2733_v31 = vpop.permute.xlu2 %2732  ;;  %v2639_v16 = vsel %vm2638_vm12, %v3226_v43, %v2635_v55  ;;  %vm2682_vm14 = vweird.f32 %v3228_v25  ;;  %vm2835_vm12 = vcmask 916480  }
 0x401   :  { %v2644_v2 = vsel %vm2641_vm13, %v2643_v28, %v2639_v16  ;;  %vm2683_vm2 = vmor %vm2681_vm15, %vm2682_vm14  ;;  %v2827_v53 = vsel %vm2826_vm8, %v2824_v13, %v2733_v31 }
 0x402   :  { %v2678_v1 = vsub.f32 1.0, %v2677_v35  ;;  %v2645_v63 = vmul.f32 %v2644_v2, %v2153_v19 }
 0x404   :  { %v2679_v22 = vmul.f32 %v3228_v25, %v2678_v1  ;;  %2798 = vrot.lane.b32.xlu1 %v2645_v63, %s3395_s14 }
 0x406   :  { %v2680_v49 = vadd.f32 %v3228_v25, %v2679_v22 }
 0x407   :  { %v1633_v9 = vpop.xlane.xlu0 %1632 }
 0x408   :  { %3229 = vrcp.f32 %v1633_v9  ;;  %v2743_v3 = vpop.permute.xlu2 %2742  ;;  %v2684_v56 = vsel %vm2683_vm2, %v3228_v25, %v2680_v49  ;;  %v2702_v6 = vand.u32 2147483648, %v1633_v9  ;;  %v2700_v61 = vand.u32 2147483647, %v1633_v9 }
 0x409   :  { %v2831_v15 = vsel %vm2829_vm1, %v2828_v46, %v2743_v3  ;;  %v2689_v34 = vsel %vm2686_vm3, %v2688_v41, %v2684_v56  ;;  %vm2696_vm5 = vweird.f32 %v1633_v9 }
 0x40a   :  { %v2690_v14 = vmul.f32 %v2689_v34, %v2220_v42  ;;  %v2703_v26 = vor.u32 1.1754944e-38, %v2702_v6  ;;  %vm2701_vm9 = vcmp.eq.f32.partialorder %v2700_v61, 8.507059e+37 }
 0x40c   :  { %2758 = vrot.lane.b32.xlu1 %v4504_v45, %s3396_s15  ;;  %2812 = vrot.lane.b32.xlu0 %v2690_v14, %s3396_s15 }
 0x40e   :  { %v3230_v62 = vpop.eup %3229 }
 0x40f   :  { %v2692_v51 = vmul.f32 %v3230_v62, %v1633_v9  ;;  %vm2697_vm4 = vweird.f32 %v3230_v62 }
 0x410   :  { %vm2698_vm6 = vmor %vm2696_vm5, %vm2697_vm4  ;;  %v2757_v11 = vpop.permute.xlu2 %2756 }
 0x411   :  { %v2693_v50 = vsub.f32 1.0, %v2692_v51 }
 0x413   :  { %v2694_v20 = vmul.f32 %v3230_v62, %v2693_v50 }
 0x415   :  { %v2695_v30 = vadd.f32 %v3230_v62, %v2694_v20 }
 0x417   :  { %v2699_v0 = vsel %vm2698_vm6, %v3230_v62, %v2695_v30 }
 0x418   :  { %v2704_v29 = vsel %vm2701_vm9, %v2703_v26, %v2699_v0  ;;  %v2773_v38 = vpop.permute.xlu2 %2772 }
 0x419   :  { %v2705_v8 = vmul.f32 %v2704_v29, %v2223_v58 }
 0x41a   :  { %v2751_v45 = vpop.permute.xlu0 %2750 }
 0x41b   :  { %v2834_v18 = vsel %vm2832_vm11, %v2831_v15, %v2751_v45  ;;  %2814 = vrot.lane.b32.xlu2 %v2705_v8, %s3396_s15 }
 0x420   :  { %v2783_v47 = vpop.permute.xlu2 %2782 }
 0x422   :  { %v2741_v37 = vpop.permute.xlu0 %2740 }
 0x423   :  { %v2830_v52 = vsel %vm2829_vm1, %v2827_v53, %v2741_v37 }
 0x424   :  { %v2833_v27 = vsel %vm2832_vm11, %v2830_v52, %v2749_v54 }
 0x425   :  { %v2836_v32 = vsel %vm2835_vm12, %v2833_v27, %v2757_v11  ;;  %v2775_v39 = vpop.permute.xlu1 %2774 }
 0x426   :  { %2852 = vst [vmem:[#allocation12] sm:$0xff] %v2836_v32 }
 0x428   :  { %v2807_v59 = vpop.permute.xlu2 %2806 }
 0x42d   :  { %v2765_v44 = vpop.permute.xlu1 %2764 }
 0x42e   :  { %v2838_v36 = vsel %vm2818_vm10, %v4327_v17, %v2765_v44 }
 0x42f   :  { %v2840_v10 = vsel %vm213_vm0, %v2838_v36, %v2773_v38 }
 0x430   :  { %v2797_v24 = vpop.permute.xlu2 %2796 }
 0x435   :  { %v2789_v4 = vpop.permute.xlu1 %2788 }
 0x438   :  { %v2767_v7 = vpop.permute.xlu0 %2766 }
 0x439   :  { %v2839_v46 = vsel %vm2818_vm10, %v4521_v21, %v2767_v7 }
 0x43a   :  { %v2841_v43 = vsel %vm213_vm0, %v2839_v46, %v2775_v39 }
 0x43b   :  { %v2843_v23 = vsel %vm2823_vm7, %v2841_v43, %v2783_v47 }
 0x440   :  { %v2791_v33 = vpop.permute.xlu0 %2790 }
 0x441   :  { %v2845_v40 = vsel %vm2826_vm8, %v2843_v23, %v2791_v33 }
 0x448   :  { %v2781_v48 = vpop.permute.xlu0 %2780 }
 0x449   :  { %v2842_v55 = vsel %vm2823_vm7, %v2840_v10, %v2781_v48 }
 0x44a   :  { %v2844_v35 = vsel %vm2826_vm8, %v2842_v55, %v2789_v4 }
 0x44b   :  { %v2846_v17 = vsel %vm2829_vm1, %v2844_v35, %v2797_v24 }
 0x450   :  { %v2805_v60 = vpop.permute.xlu0 %2804 }
 0x451   :  { %v2848_v31 = vsel %vm2832_vm11, %v2846_v17, %v2805_v60 }
 0x475   :  { %v2815_v19 = vpop.permute.xlu2 %2814 }
 0x476   :  { %v2799_v5 = vpop.permute.xlu1 %2798 }
 0x477   :  { %v2847_v25 = vsel %vm2829_vm1, %v2845_v40, %v2799_v5 }
 0x478   :  { %v2849_v21 = vsel %vm2832_vm11, %v2847_v25, %v2807_v59 }
 0x479   :  { %v2851_v28 = vsel %vm2835_vm12, %v2849_v21, %v2815_v19 }
 0x47a   :  { %2855 = vst [vmem:[#allocation12 + $0x18] sm:$0xff] %v2851_v28 }
 0x47e   :  { %v2759_v16 = vpop.permute.xlu1 %2758  ;;  %v2813_v2 = vpop.permute.xlu0 %2812 }
 0x47f   :  { %v2837_v1 = vsel %vm2835_vm12, %v2834_v18, %v2759_v16  ;;  %v2850_v63 = vsel %vm2835_vm12, %v2848_v31, %v2813_v2 }
 0x480   :  { %2854 = vst [vmem:[#allocation12 + $0x10] sm:$0xff] %v2837_v1 }
 0x481   :  { %2853 = vst [vmem:[#allocation12 + $0x8] sm:$0xff] %v2850_v63 }
 0x482   :  { %2868 = dma.vmem_to_hbm [thread:$0]  %s2861_s1, 512, %s2863_s18, [#allocation5], %s3398_s20, %s3398_s20, %s3390_s9  }
 0x483   :  { %3381 = dma.done.wait [#allocation5], 512  }
 0x484   :  { %3382 = vsyncadd [#allocation5], 4294966784 }
 0x485   :  { %2873 = vsyncpa [#allocation4], 1 }
 0x486   :  { %2874 = vsyncpa [#allocation7], 1 }
 0x487   :  { %2875 = vsyncpa [#allocation10], 1 }
 0x488   :  { %2876 = vsyncpa [#allocation5], 1 }

</bundles_post_ra>
